<compile_context>
chip_gen: v6e
topology: v6e:2x2x1
jax: 0.10.0
libtpu: 0.0.40
codegen_flags: <defaults>
</compile_context>

<pallas_src>
import functools
import numpy as np

import jax
import jax.numpy as jnp
from jax.experimental import pallas as pl
from jax.experimental.pallas import tpu as pltpu

# MXU operand dtype. bf16 operands + f32 accumulation roughly doubles MXU throughput
# and halves weight DMA bytes on v6e/v7x; set to jnp.float32 for bit-exact f32 math.
MXU_DTYPE = jnp.bfloat16

_VMEM = pltpu.MemorySpace.VMEM


# ----------------------------------------------------------------------------
# Positional encodings (same math as the reference, vectorized with numpy)
# ----------------------------------------------------------------------------
def positional_encodings(dk, context_length=2048):
    i = np.arange(dk)
    even_mask = (i % 2 == 0).astype(np.float64)
    power = 10000.0 ** (2.0 * i / dk)
    pos = np.arange(context_length)[:, None].astype(np.float64)
    angles = pos / power[None, :]
    enc = np.sin(angles) * even_mask + np.cos(angles) * (1.0 - even_mask)
    return jnp.asarray(enc, dtype=jnp.float32)


# ----------------------------------------------------------------------------
# In-kernel building blocks (traced inside the fused block kernels)
# ----------------------------------------------------------------------------
def _attention(xq, xk, xv, wq, wk, wv, wo, bo, *, heads, causal):
    """Multi-head SDP attention for one batch element.

    xq:(Tq,D), xk/xv:(Tk,D) in f32.  wq/wk/wv/wo:(D,D) in MXU_DTYPE, with per-head
    weights in contiguous column slices (wq/wk/wv) / row slices (wo); wq already
    carries the 1/sqrt(dh) score scale.  concat(heads) @ WO == sum_h O_h @ WO[rows_h],
    so no concatenate / lane relayout is needed.
    Softmax is over the QUERY axis (reference: F.softmax(y, dim=1)).
    """
    D = wq.shape[1]
    dh = D // heads
    q = jnp.dot(xq.astype(MXU_DTYPE), wq, preferred_element_type=jnp.float32)  # (Tq, D)
    k = jnp.dot(xk.astype(MXU_DTYPE), wk, preferred_element_type=jnp.float32)  # (Tk, D)
    v = jnp.dot(xv.astype(MXU_DTYPE), wv, preferred_element_type=jnp.float32)  # (Tk, D)

    Tq, Tk = xq.shape[0], xk.shape[0]
    if causal:
        qi = jax.lax.broadcasted_iota(jnp.int32, (Tq, Tk), 0)
        ki = jax.lax.broadcasted_iota(jnp.int32, (Tq, Tk), 1)
        allow = ki <= qi                                            # mask built in-kernel

    out = bo                                                        # (1, D), broadcasts
    for h in range(heads):                                          # static unroll
        sl = slice(h * dh, (h + 1) * dh)
        s = jax.lax.dot_general(                                    # (Tq, Tk) scores
            q[:, sl].astype(MXU_DTYPE), k[:, sl].astype(MXU_DTYPE),
            dimension_numbers=(((1,), (1,)), ((), ())),
            preferred_element_type=jnp.float32)
        if causal:
            s = jnp.where(allow, s, -jnp.inf)
        # softmax over the QUERY axis (axis 0 here)
        m = jnp.max(s, axis=0, keepdims=True)
        e = jnp.exp(s - m)
        z = e * pl.reciprocal(jnp.sum(e, axis=0, keepdims=True), approx=True)
        o_h = jnp.dot(z.astype(MXU_DTYPE), v[:, sl].astype(MXU_DTYPE),
                      preferred_element_type=jnp.float32)           # (Tq, dh)
        out = out + jnp.dot(o_h.astype(MXU_DTYPE), wo[sl, :],
                            preferred_element_type=jnp.float32)     # (Tq, D)
    return out


def _add_layernorm(x, res, g, b):
    """LayerNorm(x + residual) over the last dim, eps=1e-5 (torch default), f32."""
    y = x + res
    mu = jnp.mean(y, axis=-1, keepdims=True)
    var = jnp.mean(jnp.square(y - mu), axis=-1, keepdims=True)
    return (y - mu) * jax.lax.rsqrt(var + 1e-5) * g + b


def _ffn(x, w1, b1, w2, b2):
    h = jnp.dot(x.astype(MXU_DTYPE), w1, preferred_element_type=jnp.float32) + b1
    h = jnp.maximum(h, 0.0)
    return jnp.dot(h.astype(MXU_DTYPE), w2, preferred_element_type=jnp.float32) + b2


# ----------------------------------------------------------------------------
# Fused block kernels (one pallas_call per encoder / decoder block)
# ----------------------------------------------------------------------------
def encoder_block_kernel(x_ref, wq, wk, wv, wo, bo, g1, be1,
                         w1, bf1, w2, bf2, g2, be2, o_ref, *, heads):
    x = x_ref[0]                                                    # (T, D) f32
    a = _attention(x, x, x, wq[...], wk[...], wv[...], wo[...], bo[...],
                   heads=heads, causal=False)
    z = _add_layernorm(a, x, g1[...], be1[...])
    f = _ffn(z, w1[...], bf1[...], w2[...], bf2[...])
    o_ref[0] = _add_layernorm(f, z, g2[...], be2[...])


def decoder_block_kernel(x_ref, enc_ref,
                         swq, swk, swv, swo, sbo, g1, be1,
                         cwq, cwk, cwv, cwo, cbo, g2, be2,
                         w1, bf1, w2, bf2, g3, be3, o_ref, *, heads):
    x = x_ref[0]                                                    # (Tout, D)
    enc = enc_ref[0]                                                # (Tin, D)
    a = _attention(x, x, x, swq[...], swk[...], swv[...], swo[...], sbo[...],
                   heads=heads, causal=True)
    z = _add_layernorm(a, x, g1[...], be1[...])
    c = _attention(z, enc, enc, cwq[...], cwk[...], cwv[...], cwo[...], cbo[...],
                   heads=heads, causal=False)
    y = _add_layernorm(c, z, g2[...], be2[...])
    f = _ffn(y, w1[...], bf1[...], w2[...], bf2[...])
    o_ref[0] = _add_layernorm(f, y, g3[...], be3[...])


def last_pos_linear_kernel(x_ref, w_ref, b_ref, o_ref):
    o_ref[...] = (jnp.dot(x_ref[...].astype(MXU_DTYPE), w_ref[...],
                          preferred_element_type=jnp.float32) + b_ref[...])


# ----------------------------------------------------------------------------
# Pallas wrappers
# ----------------------------------------------------------------------------
def _const_spec(shape):
    zeros = (0,) * len(shape)
    return pl.BlockSpec(shape, lambda b, _z=zeros: _z)


def _attn_weight_args(p, scale):
    """(wq*scale, wk, wv, wo) cast to MXU dtype, bias kept f32."""
    return ((p["wq"] * scale).astype(MXU_DTYPE),
            p["wk"].astype(MXU_DTYPE),
            p["wv"].astype(MXU_DTYPE),
            p["wo"].astype(MXU_DTYPE),
            p["bo"])


def encoder_block(p, x, heads):
    B, T, D = x.shape
    H = p["ffn"]["w1"].shape[1]
    scale = 1.0 / float(np.sqrt(D // heads))
    wq, wk, wv, wo, bo = _attn_weight_args(p["attn"], scale)
    w1 = p["ffn"]["w1"].astype(MXU_DTYPE)
    w2 = p["ffn"]["w2"].astype(MXU_DTYPE)
    kernel = functools.partial(encoder_block_kernel, heads=heads)
    return pl.pallas_call(
        kernel,
        out_shape=jax.ShapeDtypeStruct((B, T, D), jnp.float32),
        grid=(B,),
        in_specs=[
            pl.BlockSpec((1, T, D), lambda b: (b, 0, 0)),
            _const_spec((D, D)), _const_spec((D, D)), _const_spec((D, D)),
            _const_spec((D, D)), _const_spec((1, D)),
            _const_spec((1, D)), _const_spec((1, D)),
            _const_spec((D, H)), _const_spec((1, H)),
            _const_spec((H, D)), _const_spec((1, D)),
            _const_spec((1, D)), _const_spec((1, D)),
        ],
        out_specs=pl.BlockSpec((1, T, D), lambda b: (b, 0, 0)),
        compiler_params=pltpu.CompilerParams(dimension_semantics=("parallel",)),
    )(x, wq, wk, wv, wo, bo, p["ln1"]["g"], p["ln1"]["b"],
      w1, p["ffn"]["b1"], w2, p["ffn"]["b2"], p["ln2"]["g"], p["ln2"]["b"])


def decoder_block(p, x, enc, heads):
    B, T, D = x.shape
    Tin = enc.shape[1]
    H = p["ffn"]["w1"].shape[1]
    scale = 1.0 / float(np.sqrt(D // heads))
    swq, swk, swv, swo, sbo = _attn_weight_args(p["attn"], scale)
    cwq, cwk, cwv, cwo, cbo = _attn_weight_args(p["cross"], scale)
    w1 = p["ffn"]["w1"].astype(MXU_DTYPE)
    w2 = p["ffn"]["w2"].astype(MXU_DTYPE)
    kernel = functools.partial(decoder_block_kernel, heads=heads)
    return pl.pallas_call(
        kernel,
        out_shape=jax.ShapeDtypeStruct((B, T, D), jnp.float32),
        grid=(B,),
        in_specs=[
            pl.BlockSpec((1, T, D), lambda b: (b, 0, 0)),
            pl.BlockSpec((1, Tin, D), lambda b: (b, 0, 0)),
            _const_spec((D, D)), _const_spec((D, D)), _const_spec((D, D)),
            _const_spec((D, D)), _const_spec((1, D)),
            _const_spec((1, D)), _const_spec((1, D)),
            _const_spec((D, D)), _const_spec((D, D)), _const_spec((D, D)),
            _const_spec((D, D)), _const_spec((1, D)),
            _const_spec((1, D)), _const_spec((1, D)),
            _const_spec((D, H)), _const_spec((1, H)),
            _const_spec((H, D)), _const_spec((1, D)),
            _const_spec((1, D)), _const_spec((1, D)),
        ],
        out_specs=pl.BlockSpec((1, T, D), lambda b: (b, 0, 0)),
        compiler_params=pltpu.CompilerParams(dimension_semantics=("parallel",)),
    )(x, enc,
      swq, swk, swv, swo, sbo, p["ln1"]["g"], p["ln1"]["b"],
      cwq, cwk, cwv, cwo, cbo, p["ln2"]["g"], p["ln2"]["b"],
      w1, p["ffn"]["b1"], w2, p["ffn"]["b2"], p["ln3"]["g"], p["ln3"]["b"])


def last_pos_logits(p, x_last):
    """Output projection for the last decoder position only: (B, D) @ (D, V) + b."""
    B, D = x_last.shape
    V = p["w"].shape[1]
    return pl.pallas_call(
        last_pos_linear_kernel,
        out_shape=jax.ShapeDtypeStruct((B, V), jnp.float32),
        in_specs=[pl.BlockSpec(memory_space=_VMEM)] * 3,
        out_specs=pl.BlockSpec(memory_space=_VMEM),
    )(x_last, p["w"].astype(MXU_DTYPE), p["b"])


# ----------------------------------------------------------------------------
# Model composition (plain-JAX glue around the fused Pallas block kernels)
# ----------------------------------------------------------------------------
def transformer_forward(params, input_sequence, output_sequence, *, heads):
    pos = params["pos"]

    # Embedding gathers + positional add kept as plain-JAX glue.
    in_emb = params["input_embedding"][input_sequence]              # (B, Tin, D)
    in_emb = in_emb + pos[: in_emb.shape[1]]
    enc = in_emb
    for bp in params["encoder"]:
        enc = encoder_block(bp, enc, heads)

    out_emb = params["output_embedding"][output_sequence]           # (B, Tout, D)
    out_emb = out_emb + pos[: out_emb.shape[1]]
    cur = out_emb
    for bp in params["decoder"]:
        cur = decoder_block(bp, cur, enc, heads)

    # Reference returns output_layer(values)[:, -1, :]; linear is per-position,
    # so compute logits only for the last position (cuts Tout x FLOPs & HBM traffic).
    return last_pos_logits(params["output_layer"], cur[:, -1, :])   # (B, V)


# ----------------------------------------------------------------------------
# Deterministic parameter init
# ----------------------------------------------------------------------------
def init_params(key, dmodel, hidden_dim, heads, num_blocks,
                input_vocab, output_vocab, context_length):
    keys_iter = iter(jax.random.split(key, 512))

    def dense(shape, scale=0.05):
        return jax.random.normal(next(keys_iter), shape, jnp.float32) * scale

    def mha_p():
        # Per-head projection weights stored concatenated head-major along the
        # columns of a (D, D) matrix ("input-major": x @ W). WO rows h*dh:(h+1)*dh
        # consume head h's output slice, so concat + WO == sum of per-head slices.
        return dict(wq=dense((dmodel, dmodel)),
                    wk=dense((dmodel, dmodel)),
                    wv=dense((dmodel, dmodel)),
                    wo=dense((dmodel, dmodel)),
                    bo=dense((1, dmodel)))

    def ln_p():
        return dict(g=jnp.ones((1, dmodel), jnp.float32),
                    b=jnp.zeros((1, dmodel), jnp.float32))

    def ffn_p():
        return dict(w1=dense((dmodel, hidden_dim)), b1=dense((1, hidden_dim)),
                    w2=dense((hidden_dim, dmodel)), b2=dense((1, dmodel)))

    enc_blocks = [dict(attn=mha_p(), ln1=ln_p(), ln2=ln_p(), ffn=ffn_p())
                  for _ in range(num_blocks)]
    dec_blocks = [dict(attn=mha_p(), cross=mha_p(),
                       ln1=ln_p(), ln2=ln_p(), ln3=ln_p(), ffn=ffn_p())
                  for _ in range(num_blocks)]

    return dict(
        pos=positional_encodings(dmodel, context_length),
        input_embedding=dense((input_vocab, dmodel), scale=0.1),
        output_embedding=dense((output_vocab, dmodel), scale=0.1),
        encoder=enc_blocks,
        decoder=dec_blocks,
        output_layer=dict(w=dense((dmodel, output_vocab)),
                          b=dense((1, output_vocab))),
    )


# ----------------------------------------------------------------------------
if __name__ == "__main__":
    context_length = 16
    dmodel = 32
    input_vocab_size = 13
    output_vocab_size = 11
    hidden_dim = 64
    heads = 2
    num_blocks = 2
    B, Tin, Tout = 2, 8, 8

    params = init_params(jax.random.PRNGKey(0), dmodel, hidden_dim, heads,
                         num_blocks, input_vocab_size, output_vocab_size,
                         context_length)

    k1, k2 = jax.random.split(jax.random.PRNGKey(0))
    input_seq = jax.random.randint(k1, (B, Tin), 0, input_vocab_size, dtype=jnp.int32)
    output_seq = jax.random.randint(k2, (B, Tout), 0, output_vocab_size, dtype=jnp.int32)

    fwd = jax.jit(functools.partial(transformer_forward, heads=heads))
    out = fwd(params, input_seq, output_seq)
    jax.block_until_ready(out)
    assert out.shape == (B, output_vocab_size)
    assert bool(jnp.all(jnp.isfinite(out)))
    print("KERNEL_OK")
</pallas_src>

<mosaic_0001>
module attributes {stable_mosaic.version = 11 : i64} {
  func.func @encoder_block_kernel(%arg0: i32, %arg1: memref<1x8x32xf32, #tpu.memory_space<vmem>>, %arg2: memref<32x32xbf16, #tpu.memory_space<vmem>>, %arg3: memref<32x32xbf16, #tpu.memory_space<vmem>>, %arg4: memref<32x32xbf16, #tpu.memory_space<vmem>>, %arg5: memref<32x32xbf16, #tpu.memory_space<vmem>>, %arg6: memref<1x32xf32, #tpu.memory_space<vmem>>, %arg7: memref<1x32xf32, #tpu.memory_space<vmem>>, %arg8: memref<1x32xf32, #tpu.memory_space<vmem>>, %arg9: memref<32x64xbf16, #tpu.memory_space<vmem>>, %arg10: memref<1x64xf32, #tpu.memory_space<vmem>>, %arg11: memref<64x32xbf16, #tpu.memory_space<vmem>>, %arg12: memref<1x32xf32, #tpu.memory_space<vmem>>, %arg13: memref<1x32xf32, #tpu.memory_space<vmem>>, %arg14: memref<1x32xf32, #tpu.memory_space<vmem>>, %arg15: memref<1x8x32xf32, #tpu.memory_space<vmem>>) attributes {dimension_semantics = [#tpu.dimension_semantics<parallel>], iteration_bounds = array<i64: 2>, scalar_prefetch = 0 : i64, scratch_operands = 0 : i64, tpu.core_type = #tpu.core_type<tc>, window_params = [{transform_indices = @transform_0, window_bounds = array<i64: 1, 8, 32>}, {pipeline_mode = #tpu.pipeline_mode<synchronous>, transform_indices = @transform_1, window_bounds = array<i64: 32, 32>}, {pipeline_mode = #tpu.pipeline_mode<synchronous>, transform_indices = @transform_2, window_bounds = array<i64: 32, 32>}, {pipeline_mode = #tpu.pipeline_mode<synchronous>, transform_indices = @transform_3, window_bounds = array<i64: 32, 32>}, {pipeline_mode = #tpu.pipeline_mode<synchronous>, transform_indices = @transform_4, window_bounds = array<i64: 32, 32>}, {pipeline_mode = #tpu.pipeline_mode<synchronous>, transform_indices = @transform_5, window_bounds = array<i64: 1, 32>}, {pipeline_mode = #tpu.pipeline_mode<synchronous>, transform_indices = @transform_6, window_bounds = array<i64: 1, 32>}, {pipeline_mode = #tpu.pipeline_mode<synchronous>, transform_indices = @transform_7, window_bounds = array<i64: 1, 32>}, {pipeline_mode = #tpu.pipeline_mode<synchronous>, transform_indices = @transform_8, window_bounds = array<i64: 32, 64>}, {pipeline_mode = #tpu.pipeline_mode<synchronous>, transform_indices = @transform_9, window_bounds = array<i64: 1, 64>}, {pipeline_mode = #tpu.pipeline_mode<synchronous>, transform_indices = @transform_10, window_bounds = array<i64: 64, 32>}, {pipeline_mode = #tpu.pipeline_mode<synchronous>, transform_indices = @transform_11, window_bounds = array<i64: 1, 32>}, {pipeline_mode = #tpu.pipeline_mode<synchronous>, transform_indices = @transform_12, window_bounds = array<i64: 1, 32>}, {pipeline_mode = #tpu.pipeline_mode<synchronous>, transform_indices = @transform_13, window_bounds = array<i64: 1, 32>}, {transform_indices = @transform_14, window_bounds = array<i64: 1, 8, 32>}]} {
    %c0 = arith.constant 0 : index
    %c0_0 = arith.constant 0 : index
    %c0_1 = arith.constant 0 : index
    %0 = vector.load %arg1[%c0, %c0_0, %c0_1] : memref<1x8x32xf32, #tpu.memory_space<vmem>>, vector<1x8x32xf32>
    %1 = vector.shape_cast %0 : vector<1x8x32xf32> to vector<8x32xf32>
    %c0_2 = arith.constant 0 : index
    %c0_3 = arith.constant 0 : index
    %2 = vector.load %arg2[%c0_2, %c0_3] : memref<32x32xbf16, #tpu.memory_space<vmem>>, vector<32x32xbf16>
    %c0_4 = arith.constant 0 : index
    %c0_5 = arith.constant 0 : index
    %3 = vector.load %arg3[%c0_4, %c0_5] : memref<32x32xbf16, #tpu.memory_space<vmem>>, vector<32x32xbf16>
    %c0_6 = arith.constant 0 : index
    %c0_7 = arith.constant 0 : index
    %4 = vector.load %arg4[%c0_6, %c0_7] : memref<32x32xbf16, #tpu.memory_space<vmem>>, vector<32x32xbf16>
    %c0_8 = arith.constant 0 : index
    %c0_9 = arith.constant 0 : index
    %5 = vector.load %arg5[%c0_8, %c0_9] : memref<32x32xbf16, #tpu.memory_space<vmem>>, vector<32x32xbf16>
    %c0_10 = arith.constant 0 : index
    %c0_11 = arith.constant 0 : index
    %6 = vector.load %arg6[%c0_10, %c0_11] : memref<1x32xf32, #tpu.memory_space<vmem>>, vector<1x32xf32>
    %7 = arith.truncf %1 : vector<8x32xf32> to vector<8x32xbf16>
    %cst = arith.constant dense<0.000000e+00> : vector<8x32xf32>
    %8 = tpu.matmul %7, %2, %cst {dimension_numbers = #tpu.dot_dimension_numbers<[1], [0], [0], [1], [0, 0, 1, 1], [], []>} : vector<8x32xbf16>, vector<32x32xbf16>, vector<8x32xf32> -> vector<8x32xf32>
    %9 = arith.truncf %1 : vector<8x32xf32> to vector<8x32xbf16>
    %cst_12 = arith.constant dense<0.000000e+00> : vector<8x32xf32>
    %10 = tpu.matmul %9, %3, %cst_12 {dimension_numbers = #tpu.dot_dimension_numbers<[1], [0], [0], [1], [0, 0, 1, 1], [], []>} : vector<8x32xbf16>, vector<32x32xbf16>, vector<8x32xf32> -> vector<8x32xf32>
    %11 = arith.truncf %1 : vector<8x32xf32> to vector<8x32xbf16>
    %cst_13 = arith.constant dense<0.000000e+00> : vector<8x32xf32>
    %12 = tpu.matmul %11, %4, %cst_13 {dimension_numbers = #tpu.dot_dimension_numbers<[1], [0], [0], [1], [0, 0, 1, 1], [], []>} : vector<8x32xbf16>, vector<32x32xbf16>, vector<8x32xf32> -> vector<8x32xf32>
    %13 = vector.extract_strided_slice %8 {offsets = [0, 0], sizes = [8, 16], strides = [1, 1]} : vector<8x32xf32> to vector<8x16xf32>
    %14 = arith.truncf %13 : vector<8x16xf32> to vector<8x16xbf16>
    %15 = vector.extract_strided_slice %10 {offsets = [0, 0], sizes = [8, 16], strides = [1, 1]} : vector<8x32xf32> to vector<8x16xf32>
    %16 = arith.truncf %15 : vector<8x16xf32> to vector<8x16xbf16>
    %cst_14 = arith.constant dense<0.000000e+00> : vector<8x8xf32>
    %17 = tpu.matmul %14, %16, %cst_14 {dimension_numbers = #tpu.dot_dimension_numbers<[1], [1], [0], [0], [0, 0, 1, 0], [], []>} : vector<8x16xbf16>, vector<8x16xbf16>, vector<8x8xf32> -> vector<8x8xf32>
    %cst_15 = arith.constant dense<0xFF800000> : vector<8xf32>
    %18 = vector.multi_reduction <maximumf>, %17, %cst_15 [0] : vector<8x8xf32> to vector<8xf32>
    %19 = vector.shape_cast %18 : vector<8xf32> to vector<1x8xf32>
    %20 = vector.broadcast %19 : vector<1x8xf32> to vector<8x8xf32>
    %21 = arith.subf %17, %20 : vector<8x8xf32>
    %22 = math.exp %21 : vector<8x8xf32>
    %cst_16 = arith.constant dense<0.000000e+00> : vector<8xf32>
    %23 = vector.multi_reduction <add>, %22, %cst_16 [0] : vector<8x8xf32> to vector<8xf32>
    %24 = vector.shape_cast %23 : vector<8xf32> to vector<1x8xf32>
    %25 = tpu.reciprocal %24 {approx = true} : vector<1x8xf32> -> vector<1x8xf32>
    %26 = vector.broadcast %25 : vector<1x8xf32> to vector<8x8xf32>
    %27 = arith.mulf %22, %26 : vector<8x8xf32>
    %28 = arith.truncf %27 : vector<8x8xf32> to vector<8x8xbf16>
    %29 = vector.extract_strided_slice %12 {offsets = [0, 0], sizes = [8, 16], strides = [1, 1]} : vector<8x32xf32> to vector<8x16xf32>
    %30 = arith.truncf %29 : vector<8x16xf32> to vector<8x16xbf16>
    %cst_17 = arith.constant dense<0.000000e+00> : vector<8x16xf32>
    %31 = tpu.matmul %28, %30, %cst_17 {dimension_numbers = #tpu.dot_dimension_numbers<[1], [0], [0], [1], [0, 0, 1, 1], [], []>} : vector<8x8xbf16>, vector<8x16xbf16>, vector<8x16xf32> -> vector<8x16xf32>
    %32 = arith.truncf %31 : vector<8x16xf32> to vector<8x16xbf16>
    %33 = vector.extract_strided_slice %5 {offsets = [0, 0], sizes = [16, 32], strides = [1, 1]} : vector<32x32xbf16> to vector<16x32xbf16>
    %cst_18 = arith.constant dense<0.000000e+00> : vector<8x32xf32>
    %34 = tpu.matmul %32, %33, %cst_18 {dimension_numbers = #tpu.dot_dimension_numbers<[1], [0], [0], [1], [0, 0, 1, 1], [], []>} : vector<8x16xbf16>, vector<16x32xbf16>, vector<8x32xf32> -> vector<8x32xf32>
    %35 = vector.broadcast %6 : vector<1x32xf32> to vector<8x32xf32>
    %36 = arith.addf %35, %34 : vector<8x32xf32>
    %37 = vector.extract_strided_slice %8 {offsets = [0, 16], sizes = [8, 16], strides = [1, 1]} : vector<8x32xf32> to vector<8x16xf32>
    %38 = arith.truncf %37 : vector<8x16xf32> to vector<8x16xbf16>
    %39 = vector.extract_strided_slice %10 {offsets = [0, 16], sizes = [8, 16], strides = [1, 1]} : vector<8x32xf32> to vector<8x16xf32>
    %40 = arith.truncf %39 : vector<8x16xf32> to vector<8x16xbf16>
    %cst_19 = arith.constant dense<0.000000e+00> : vector<8x8xf32>
    %41 = tpu.matmul %38, %40, %cst_19 {dimension_numbers = #tpu.dot_dimension_numbers<[1], [1], [0], [0], [0, 0, 1, 0], [], []>} : vector<8x16xbf16>, vector<8x16xbf16>, vector<8x8xf32> -> vector<8x8xf32>
    %cst_20 = arith.constant dense<0xFF800000> : vector<8xf32>
    %42 = vector.multi_reduction <maximumf>, %41, %cst_20 [0] : vector<8x8xf32> to vector<8xf32>
    %43 = vector.shape_cast %42 : vector<8xf32> to vector<1x8xf32>
    %44 = vector.broadcast %43 : vector<1x8xf32> to vector<8x8xf32>
    %45 = arith.subf %41, %44 : vector<8x8xf32>
    %46 = math.exp %45 : vector<8x8xf32>
    %cst_21 = arith.constant dense<0.000000e+00> : vector<8xf32>
    %47 = vector.multi_reduction <add>, %46, %cst_21 [0] : vector<8x8xf32> to vector<8xf32>
    %48 = vector.shape_cast %47 : vector<8xf32> to vector<1x8xf32>
    %49 = tpu.reciprocal %48 {approx = true} : vector<1x8xf32> -> vector<1x8xf32>
    %50 = vector.broadcast %49 : vector<1x8xf32> to vector<8x8xf32>
    %51 = arith.mulf %46, %50 : vector<8x8xf32>
    %52 = arith.truncf %51 : vector<8x8xf32> to vector<8x8xbf16>
    %53 = vector.extract_strided_slice %12 {offsets = [0, 16], sizes = [8, 16], strides = [1, 1]} : vector<8x32xf32> to vector<8x16xf32>
    %54 = arith.truncf %53 : vector<8x16xf32> to vector<8x16xbf16>
    %cst_22 = arith.constant dense<0.000000e+00> : vector<8x16xf32>
    %55 = tpu.matmul %52, %54, %cst_22 {dimension_numbers = #tpu.dot_dimension_numbers<[1], [0], [0], [1], [0, 0, 1, 1], [], []>} : vector<8x8xbf16>, vector<8x16xbf16>, vector<8x16xf32> -> vector<8x16xf32>
    %56 = arith.truncf %55 : vector<8x16xf32> to vector<8x16xbf16>
    %57 = vector.extract_strided_slice %5 {offsets = [16, 0], sizes = [16, 32], strides = [1, 1]} : vector<32x32xbf16> to vector<16x32xbf16>
    %cst_23 = arith.constant dense<0.000000e+00> : vector<8x32xf32>
    %58 = tpu.matmul %56, %57, %cst_23 {dimension_numbers = #tpu.dot_dimension_numbers<[1], [0], [0], [1], [0, 0, 1, 1], [], []>} : vector<8x16xbf16>, vector<16x32xbf16>, vector<8x32xf32> -> vector<8x32xf32>
    %59 = arith.addf %36, %58 : vector<8x32xf32>
    %c0_24 = arith.constant 0 : index
    %c0_25 = arith.constant 0 : index
    %60 = vector.load %arg7[%c0_24, %c0_25] : memref<1x32xf32, #tpu.memory_space<vmem>>, vector<1x32xf32>
    %c0_26 = arith.constant 0 : index
    %c0_27 = arith.constant 0 : index
    %61 = vector.load %arg8[%c0_26, %c0_27] : memref<1x32xf32, #tpu.memory_space<vmem>>, vector<1x32xf32>
    %62 = arith.addf %59, %1 : vector<8x32xf32>
    %cst_28 = arith.constant dense<0.000000e+00> : vector<8xf32>
    %63 = vector.multi_reduction <add>, %62, %cst_28 [1] : vector<8x32xf32> to vector<8xf32>
    %64 = vector.shape_cast %63 : vector<8xf32> to vector<8x1xf32>
    %cst_29 = arith.constant 3.200000e+01 : f32
    %65 = vector.broadcast %cst_29 : f32 to vector<8x1xf32>
    %66 = arith.divf %64, %65 : vector<8x1xf32>
    %67 = vector.broadcast %66 : vector<8x1xf32> to vector<8x32xf32>
    %68 = arith.subf %62, %67 : vector<8x32xf32>
    %69 = arith.mulf %68, %68 : vector<8x32xf32>
    %cst_30 = arith.constant dense<0.000000e+00> : vector<8xf32>
    %70 = vector.multi_reduction <add>, %69, %cst_30 [1] : vector<8x32xf32> to vector<8xf32>
    %71 = vector.shape_cast %70 : vector<8xf32> to vector<8x1xf32>
    %cst_31 = arith.constant 3.200000e+01 : f32
    %72 = vector.broadcast %cst_31 : f32 to vector<8x1xf32>
    %73 = arith.divf %71, %72 : vector<8x1xf32>
    %74 = vector.broadcast %66 : vector<8x1xf32> to vector<8x32xf32>
    %75 = arith.subf %62, %74 : vector<8x32xf32>
    %cst_32 = arith.constant 9.99999974E-6 : f32
    %76 = vector.broadcast %cst_32 : f32 to vector<8x1xf32>
    %77 = arith.addf %73, %76 : vector<8x1xf32>
    %78 = math.rsqrt %77 : vector<8x1xf32>
    %79 = vector.broadcast %78 : vector<8x1xf32> to vector<8x32xf32>
    %80 = arith.mulf %75, %79 : vector<8x32xf32>
    %81 = vector.broadcast %60 : vector<1x32xf32> to vector<8x32xf32>
    %82 = arith.mulf %80, %81 : vector<8x32xf32>
    %83 = vector.broadcast %61 : vector<1x32xf32> to vector<8x32xf32>
    %84 = arith.addf %82, %83 : vector<8x32xf32>
    %c0_33 = arith.constant 0 : index
    %c0_34 = arith.constant 0 : index
    %85 = vector.load %arg9[%c0_33, %c0_34] : memref<32x64xbf16, #tpu.memory_space<vmem>>, vector<32x64xbf16>
    %c0_35 = arith.constant 0 : index
    %c0_36 = arith.constant 0 : index
    %86 = vector.load %arg10[%c0_35, %c0_36] : memref<1x64xf32, #tpu.memory_space<vmem>>, vector<1x64xf32>
    %c0_37 = arith.constant 0 : index
    %c0_38 = arith.constant 0 : index
    %87 = vector.load %arg11[%c0_37, %c0_38] : memref<64x32xbf16, #tpu.memory_space<vmem>>, vector<64x32xbf16>
    %c0_39 = arith.constant 0 : index
    %c0_40 = arith.constant 0 : index
    %88 = vector.load %arg12[%c0_39, %c0_40] : memref<1x32xf32, #tpu.memory_space<vmem>>, vector<1x32xf32>
    %89 = arith.truncf %84 : vector<8x32xf32> to vector<8x32xbf16>
    %cst_41 = arith.constant dense<0.000000e+00> : vector<8x64xf32>
    %90 = tpu.matmul %89, %85, %cst_41 {dimension_numbers = #tpu.dot_dimension_numbers<[1], [0], [0], [1], [0, 0, 1, 1], [], []>} : vector<8x32xbf16>, vector<32x64xbf16>, vector<8x64xf32> -> vector<8x64xf32>
    %91 = vector.broadcast %86 : vector<1x64xf32> to vector<8x64xf32>
    %92 = arith.addf %90, %91 : vector<8x64xf32>
    %cst_42 = arith.constant 0.000000e+00 : f32
    %93 = vector.broadcast %cst_42 : f32 to vector<8x64xf32>
    %94 = arith.maximumf %92, %93 : vector<8x64xf32>
    %95 = arith.truncf %94 : vector<8x64xf32> to vector<8x64xbf16>
    %cst_43 = arith.constant dense<0.000000e+00> : vector<8x32xf32>
    %96 = tpu.matmul %95, %87, %cst_43 {dimension_numbers = #tpu.dot_dimension_numbers<[1], [0], [0], [1], [0, 0, 1, 1], [], []>} : vector<8x64xbf16>, vector<64x32xbf16>, vector<8x32xf32> -> vector<8x32xf32>
    %97 = vector.broadcast %88 : vector<1x32xf32> to vector<8x32xf32>
    %98 = arith.addf %96, %97 : vector<8x32xf32>
    %c0_44 = arith.constant 0 : index
    %c0_45 = arith.constant 0 : index
    %99 = vector.load %arg13[%c0_44, %c0_45] : memref<1x32xf32, #tpu.memory_space<vmem>>, vector<1x32xf32>
    %c0_46 = arith.constant 0 : index
    %c0_47 = arith.constant 0 : index
    %100 = vector.load %arg14[%c0_46, %c0_47] : memref<1x32xf32, #tpu.memory_space<vmem>>, vector<1x32xf32>
    %101 = arith.addf %98, %84 : vector<8x32xf32>
    %cst_48 = arith.constant dense<0.000000e+00> : vector<8xf32>
    %102 = vector.multi_reduction <add>, %101, %cst_48 [1] : vector<8x32xf32> to vector<8xf32>
    %103 = vector.shape_cast %102 : vector<8xf32> to vector<8x1xf32>
    %cst_49 = arith.constant 3.200000e+01 : f32
    %104 = vector.broadcast %cst_49 : f32 to vector<8x1xf32>
    %105 = arith.divf %103, %104 : vector<8x1xf32>
    %106 = vector.broadcast %105 : vector<8x1xf32> to vector<8x32xf32>
    %107 = arith.subf %101, %106 : vector<8x32xf32>
    %108 = arith.mulf %107, %107 : vector<8x32xf32>
    %cst_50 = arith.constant dense<0.000000e+00> : vector<8xf32>
    %109 = vector.multi_reduction <add>, %108, %cst_50 [1] : vector<8x32xf32> to vector<8xf32>
    %110 = vector.shape_cast %109 : vector<8xf32> to vector<8x1xf32>
    %cst_51 = arith.constant 3.200000e+01 : f32
    %111 = vector.broadcast %cst_51 : f32 to vector<8x1xf32>
    %112 = arith.divf %110, %111 : vector<8x1xf32>
    %113 = vector.broadcast %105 : vector<8x1xf32> to vector<8x32xf32>
    %114 = arith.subf %101, %113 : vector<8x32xf32>
    %cst_52 = arith.constant 9.99999974E-6 : f32
    %115 = vector.broadcast %cst_52 : f32 to vector<8x1xf32>
    %116 = arith.addf %112, %115 : vector<8x1xf32>
    %117 = math.rsqrt %116 : vector<8x1xf32>
    %118 = vector.broadcast %117 : vector<8x1xf32> to vector<8x32xf32>
    %119 = arith.mulf %114, %118 : vector<8x32xf32>
    %120 = vector.broadcast %99 : vector<1x32xf32> to vector<8x32xf32>
    %121 = arith.mulf %119, %120 : vector<8x32xf32>
    %122 = vector.broadcast %100 : vector<1x32xf32> to vector<8x32xf32>
    %123 = arith.addf %121, %122 : vector<8x32xf32>
    %c0_53 = arith.constant 0 : index
    %c0_54 = arith.constant 0 : index
    %c0_55 = arith.constant 0 : index
    %124 = vector.load %arg15[%c0_53, %c0_54, %c0_55] : memref<1x8x32xf32, #tpu.memory_space<vmem>>, vector<1x8x32xf32>
    %125 = vector.shape_cast %124 : vector<1x8x32xf32> to vector<8x32xf32>
    %126 = vector.shape_cast %123 : vector<8x32xf32> to vector<1x8x32xf32>
    tpu.vector_store %arg15[%c0_53, %c0_54, %c0_55], %126 {strides = array<i32>} : memref<1x8x32xf32, #tpu.memory_space<vmem>>, vector<1x8x32xf32>,
    return
  }
  func.func @transform_0(%arg0: i32) -> (i32, i32, i32) {
    %c0_i32 = arith.constant 0 : i32
    %c0_i32_0 = arith.constant 0 : i32
    %c0_i32_1 = arith.constant 0 : i32
    return %arg0, %c0_i32, %c0_i32_0 : i32, i32, i32
  }
  func.func @transform_1(%arg0: i32) -> (i32, i32) {
    %c0_i32 = arith.constant 0 : i32
    %c0_i32_0 = arith.constant 0 : i32
    %c0_i32_1 = arith.constant 0 : i32
    return %c0_i32, %c0_i32_0 : i32, i32
  }
  func.func @transform_2(%arg0: i32) -> (i32, i32) {
    %c0_i32 = arith.constant 0 : i32
    %c0_i32_0 = arith.constant 0 : i32
    %c0_i32_1 = arith.constant 0 : i32
    return %c0_i32, %c0_i32_0 : i32, i32
  }
  func.func @transform_3(%arg0: i32) -> (i32, i32) {
    %c0_i32 = arith.constant 0 : i32
    %c0_i32_0 = arith.constant 0 : i32
    %c0_i32_1 = arith.constant 0 : i32
    return %c0_i32, %c0_i32_0 : i32, i32
  }
  func.func @transform_4(%arg0: i32) -> (i32, i32) {
    %c0_i32 = arith.constant 0 : i32
    %c0_i32_0 = arith.constant 0 : i32
    %c0_i32_1 = arith.constant 0 : i32
    return %c0_i32, %c0_i32_0 : i32, i32
  }
  func.func @transform_5(%arg0: i32) -> (i32, i32) {
    %c0_i32 = arith.constant 0 : i32
    %c0_i32_0 = arith.constant 0 : i32
    %c0_i32_1 = arith.constant 0 : i32
    return %c0_i32, %c0_i32_0 : i32, i32
  }
  func.func @transform_6(%arg0: i32) -> (i32, i32) {
    %c0_i32 = arith.constant 0 : i32
    %c0_i32_0 = arith.constant 0 : i32
    %c0_i32_1 = arith.constant 0 : i32
    return %c0_i32, %c0_i32_0 : i32, i32
  }
  func.func @transform_7(%arg0: i32) -> (i32, i32) {
    %c0_i32 = arith.constant 0 : i32
    %c0_i32_0 = arith.constant 0 : i32
    %c0_i32_1 = arith.constant 0 : i32
    return %c0_i32, %c0_i32_0 : i32, i32
  }
  func.func @transform_8(%arg0: i32) -> (i32, i32) {
    %c0_i32 = arith.constant 0 : i32
    %c0_i32_0 = arith.constant 0 : i32
    %c0_i32_1 = arith.constant 0 : i32
    return %c0_i32, %c0_i32_0 : i32, i32
  }
  func.func @transform_9(%arg0: i32) -> (i32, i32) {
    %c0_i32 = arith.constant 0 : i32
    %c0_i32_0 = arith.constant 0 : i32
    %c0_i32_1 = arith.constant 0 : i32
    return %c0_i32, %c0_i32_0 : i32, i32
  }
  func.func @transform_10(%arg0: i32) -> (i32, i32) {
    %c0_i32 = arith.constant 0 : i32
    %c0_i32_0 = arith.constant 0 : i32
    %c0_i32_1 = arith.constant 0 : i32
    return %c0_i32, %c0_i32_0 : i32, i32
  }
  func.func @transform_11(%arg0: i32) -> (i32, i32) {
    %c0_i32 = arith.constant 0 : i32
    %c0_i32_0 = arith.constant 0 : i32
    %c0_i32_1 = arith.constant 0 : i32
    return %c0_i32, %c0_i32_0 : i32, i32
  }
  func.func @transform_12(%arg0: i32) -> (i32, i32) {
    %c0_i32 = arith.constant 0 : i32
    %c0_i32_0 = arith.constant 0 : i32
    %c0_i32_1 = arith.constant 0 : i32
    return %c0_i32, %c0_i32_0 : i32, i32
  }
  func.func @transform_13(%arg0: i32) -> (i32, i32) {
    %c0_i32 = arith.constant 0 : i32
    %c0_i32_0 = arith.constant 0 : i32
    %c0_i32_1 = arith.constant 0 : i32
    return %c0_i32, %c0_i32_0 : i32, i32
  }
  func.func @transform_14(%arg0: i32) -> (i32, i32, i32) {
    %c0_i32 = arith.constant 0 : i32
    %c0_i32_0 = arith.constant 0 : i32
    %c0_i32_1 = arith.constant 0 : i32
    return %arg0, %c0_i32, %c0_i32_0 : i32, i32, i32
  }
}

module attributes {stable_mosaic.version = 11 : i64} {
  func.func @last_pos_linear_kernel(%arg0: memref<2x32xf32, #tpu.memory_space<vmem>>, %arg1: memref<32x11xbf16, #tpu.memory_space<vmem>>, %arg2: memref<1x11xf32, #tpu.memory_space<vmem>>, %arg3: memref<2x11xf32, #tpu.memory_space<vmem>>) attributes {dimension_semantics = [], scalar_prefetch = 0 : i64, scratch_operands = 0 : i64, tpu.core_type = #tpu.core_type<tc>} {
    %c0 = arith.constant 0 : index
    %c0_0 = arith.constant 0 : index
    %0 = vector.load %arg0[%c0, %c0_0] : memref<2x32xf32, #tpu.memory_space<vmem>>, vector<2x32xf32>
    %1 = arith.truncf %0 : vector<2x32xf32> to vector<2x32xbf16>
    %c0_1 = arith.constant 0 : index
    %c0_2 = arith.constant 0 : index
    %2 = vector.load %arg1[%c0_1, %c0_2] : memref<32x11xbf16, #tpu.memory_space<vmem>>, vector<32x11xbf16>
    %cst = arith.constant dense<0.000000e+00> : vector<2x11xf32>
    %3 = tpu.matmul %1, %2, %cst {dimension_numbers = #tpu.dot_dimension_numbers<[1], [0], [0], [1], [0, 0, 1, 1], [], []>} : vector<2x32xbf16>, vector<32x11xbf16>, vector<2x11xf32> -> vector<2x11xf32>
    %c0_3 = arith.constant 0 : index
    %c0_4 = arith.constant 0 : index
    %4 = vector.load %arg2[%c0_3, %c0_4] : memref<1x11xf32, #tpu.memory_space<vmem>>, vector<1x11xf32>
    %5 = vector.broadcast %4 : vector<1x11xf32> to vector<2x11xf32>
    %6 = arith.addf %3, %5 : vector<2x11xf32>
    %c0_5 = arith.constant 0 : index
    %c0_6 = arith.constant 0 : index
    %7 = vector.load %arg3[%c0_5, %c0_6] : memref<2x11xf32, #tpu.memory_space<vmem>>, vector<2x11xf32>
    tpu.vector_store %arg3[%c0_5, %c0_6], %6 {strides = array<i32>} : memref<2x11xf32, #tpu.memory_space<vmem>>, vector<2x11xf32>,
    return
  }
}

module attributes {stable_mosaic.version = 11 : i64} {
  func.func @decoder_block_kernel(%arg0: i32, %arg1: memref<1x8x32xf32, #tpu.memory_space<vmem>>, %arg2: memref<1x8x32xf32, #tpu.memory_space<vmem>>, %arg3: memref<32x32xbf16, #tpu.memory_space<vmem>>, %arg4: memref<32x32xbf16, #tpu.memory_space<vmem>>, %arg5: memref<32x32xbf16, #tpu.memory_space<vmem>>, %arg6: memref<32x32xbf16, #tpu.memory_space<vmem>>, %arg7: memref<1x32xf32, #tpu.memory_space<vmem>>, %arg8: memref<1x32xf32, #tpu.memory_space<vmem>>, %arg9: memref<1x32xf32, #tpu.memory_space<vmem>>, %arg10: memref<32x32xbf16, #tpu.memory_space<vmem>>, %arg11: memref<32x32xbf16, #tpu.memory_space<vmem>>, %arg12: memref<32x32xbf16, #tpu.memory_space<vmem>>, %arg13: memref<32x32xbf16, #tpu.memory_space<vmem>>, %arg14: memref<1x32xf32, #tpu.memory_space<vmem>>, %arg15: memref<1x32xf32, #tpu.memory_space<vmem>>, %arg16: memref<1x32xf32, #tpu.memory_space<vmem>>, %arg17: memref<32x64xbf16, #tpu.memory_space<vmem>>, %arg18: memref<1x64xf32, #tpu.memory_space<vmem>>, %arg19: memref<64x32xbf16, #tpu.memory_space<vmem>>, %arg20: memref<1x32xf32, #tpu.memory_space<vmem>>, %arg21: memref<1x32xf32, #tpu.memory_space<vmem>>, %arg22: memref<1x32xf32, #tpu.memory_space<vmem>>, %arg23: memref<1x8x32xf32, #tpu.memory_space<vmem>>) attributes {dimension_semantics = [#tpu.dimension_semantics<parallel>], iteration_bounds = array<i64: 2>, scalar_prefetch = 0 : i64, scratch_operands = 0 : i64, tpu.core_type = #tpu.core_type<tc>, window_params = [{transform_indices = @transform_0, window_bounds = array<i64: 1, 8, 32>}, {transform_indices = @transform_1, window_bounds = array<i64: 1, 8, 32>}, {pipeline_mode = #tpu.pipeline_mode<synchronous>, transform_indices = @transform_2, window_bounds = array<i64: 32, 32>}, {pipeline_mode = #tpu.pipeline_mode<synchronous>, transform_indices = @transform_3, window_bounds = array<i64: 32, 32>}, {pipeline_mode = #tpu.pipeline_mode<synchronous>, transform_indices = @transform_4, window_bounds = array<i64: 32, 32>}, {pipeline_mode = #tpu.pipeline_mode<synchronous>, transform_indices = @transform_5, window_bounds = array<i64: 32, 32>}, {pipeline_mode = #tpu.pipeline_mode<synchronous>, transform_indices = @transform_6, window_bounds = array<i64: 1, 32>}, {pipeline_mode = #tpu.pipeline_mode<synchronous>, transform_indices = @transform_7, window_bounds = array<i64: 1, 32>}, {pipeline_mode = #tpu.pipeline_mode<synchronous>, transform_indices = @transform_8, window_bounds = array<i64: 1, 32>}, {pipeline_mode = #tpu.pipeline_mode<synchronous>, transform_indices = @transform_9, window_bounds = array<i64: 32, 32>}, {pipeline_mode = #tpu.pipeline_mode<synchronous>, transform_indices = @transform_10, window_bounds = array<i64: 32, 32>}, {pipeline_mode = #tpu.pipeline_mode<synchronous>, transform_indices = @transform_11, window_bounds = array<i64: 32, 32>}, {pipeline_mode = #tpu.pipeline_mode<synchronous>, transform_indices = @transform_12, window_bounds = array<i64: 32, 32>}, {pipeline_mode = #tpu.pipeline_mode<synchronous>, transform_indices = @transform_13, window_bounds = array<i64: 1, 32>}, {pipeline_mode = #tpu.pipeline_mode<synchronous>, transform_indices = @transform_14, window_bounds = array<i64: 1, 32>}, {pipeline_mode = #tpu.pipeline_mode<synchronous>, transform_indices = @transform_15, window_bounds = array<i64: 1, 32>}, {pipeline_mode = #tpu.pipeline_mode<synchronous>, transform_indices = @transform_16, window_bounds = array<i64: 32, 64>}, {pipeline_mode = #tpu.pipeline_mode<synchronous>, transform_indices = @transform_17, window_bounds = array<i64: 1, 64>}, {pipeline_mode = #tpu.pipeline_mode<synchronous>, transform_indices = @transform_18, window_bounds = array<i64: 64, 32>}, {pipeline_mode = #tpu.pipeline_mode<synchronous>, transform_indices = @transform_19, window_bounds = array<i64: 1, 32>}, {pipeline_mode = #tpu.pipeline_mode<synchronous>, transform_indices = @transform_20, window_bounds = array<i64: 1, 32>}, {pipeline_mode = #tpu.pipeline_mode<synchronous>, transform_indices = @transform_21, window_bounds = array<i64: 1, 32>}, {transform_indices = @transform_22, window_bounds = array<i64: 1, 8, 32>}]} {
    %c0 = arith.constant 0 : index
    %c0_0 = arith.constant 0 : index
    %c0_1 = arith.constant 0 : index
    %0 = vector.load %arg1[%c0, %c0_0, %c0_1] : memref<1x8x32xf32, #tpu.memory_space<vmem>>, vector<1x8x32xf32>
    %1 = vector.shape_cast %0 : vector<1x8x32xf32> to vector<8x32xf32>
    %c0_2 = arith.constant 0 : index
    %c0_3 = arith.constant 0 : index
    %c0_4 = arith.constant 0 : index
    %2 = vector.load %arg2[%c0_2, %c0_3, %c0_4] : memref<1x8x32xf32, #tpu.memory_space<vmem>>, vector<1x8x32xf32>
    %3 = vector.shape_cast %2 : vector<1x8x32xf32> to vector<8x32xf32>
    %c0_5 = arith.constant 0 : index
    %c0_6 = arith.constant 0 : index
    %4 = vector.load %arg3[%c0_5, %c0_6] : memref<32x32xbf16, #tpu.memory_space<vmem>>, vector<32x32xbf16>
    %c0_7 = arith.constant 0 : index
    %c0_8 = arith.constant 0 : index
    %5 = vector.load %arg4[%c0_7, %c0_8] : memref<32x32xbf16, #tpu.memory_space<vmem>>, vector<32x32xbf16>
    %c0_9 = arith.constant 0 : index
    %c0_10 = arith.constant 0 : index
    %6 = vector.load %arg5[%c0_9, %c0_10] : memref<32x32xbf16, #tpu.memory_space<vmem>>, vector<32x32xbf16>
    %c0_11 = arith.constant 0 : index
    %c0_12 = arith.constant 0 : index
    %7 = vector.load %arg6[%c0_11, %c0_12] : memref<32x32xbf16, #tpu.memory_space<vmem>>, vector<32x32xbf16>
    %c0_13 = arith.constant 0 : index
    %c0_14 = arith.constant 0 : index
    %8 = vector.load %arg7[%c0_13, %c0_14] : memref<1x32xf32, #tpu.memory_space<vmem>>, vector<1x32xf32>
    %9 = arith.truncf %1 : vector<8x32xf32> to vector<8x32xbf16>
    %cst = arith.constant dense<0.000000e+00> : vector<8x32xf32>
    %10 = tpu.matmul %9, %4, %cst {dimension_numbers = #tpu.dot_dimension_numbers<[1], [0], [0], [1], [0, 0, 1, 1], [], []>} : vector<8x32xbf16>, vector<32x32xbf16>, vector<8x32xf32> -> vector<8x32xf32>
    %11 = arith.truncf %1 : vector<8x32xf32> to vector<8x32xbf16>
    %cst_15 = arith.constant dense<0.000000e+00> : vector<8x32xf32>
    %12 = tpu.matmul %11, %5, %cst_15 {dimension_numbers = #tpu.dot_dimension_numbers<[1], [0], [0], [1], [0, 0, 1, 1], [], []>} : vector<8x32xbf16>, vector<32x32xbf16>, vector<8x32xf32> -> vector<8x32xf32>
    %13 = arith.truncf %1 : vector<8x32xf32> to vector<8x32xbf16>
    %cst_16 = arith.constant dense<0.000000e+00> : vector<8x32xf32>
    %14 = tpu.matmul %13, %6, %cst_16 {dimension_numbers = #tpu.dot_dimension_numbers<[1], [0], [0], [1], [0, 0, 1, 1], [], []>} : vector<8x32xbf16>, vector<32x32xbf16>, vector<8x32xf32> -> vector<8x32xf32>
    %15 = tpu.iota {dimensions = array<i32: 0>} : vector<8x8xi32>
    %16 = tpu.iota {dimensions = array<i32: 1>} : vector<8x8xi32>
    %17 = arith.cmpi sle, %16, %15 : vector<8x8xi32>
    %18 = vector.extract_strided_slice %10 {offsets = [0, 0], sizes = [8, 16], strides = [1, 1]} : vector<8x32xf32> to vector<8x16xf32>
    %19 = arith.truncf %18 : vector<8x16xf32> to vector<8x16xbf16>
    %20 = vector.extract_strided_slice %12 {offsets = [0, 0], sizes = [8, 16], strides = [1, 1]} : vector<8x32xf32> to vector<8x16xf32>
    %21 = arith.truncf %20 : vector<8x16xf32> to vector<8x16xbf16>
    %cst_17 = arith.constant dense<0.000000e+00> : vector<8x8xf32>
    %22 = tpu.matmul %19, %21, %cst_17 {dimension_numbers = #tpu.dot_dimension_numbers<[1], [1], [0], [0], [0, 0, 1, 0], [], []>} : vector<8x16xbf16>, vector<8x16xbf16>, vector<8x8xf32> -> vector<8x8xf32>
    %cst_18 = arith.constant 0xFF800000 : f32
    %23 = vector.broadcast %cst_18 : f32 to vector<8x8xf32>
    %24 = arith.select %17, %22, %23 : vector<8x8xi1>, vector<8x8xf32>
    %cst_19 = arith.constant dense<0xFF800000> : vector<8xf32>
    %25 = vector.multi_reduction <maximumf>, %24, %cst_19 [0] : vector<8x8xf32> to vector<8xf32>
    %26 = vector.shape_cast %25 : vector<8xf32> to vector<1x8xf32>
    %27 = vector.broadcast %26 : vector<1x8xf32> to vector<8x8xf32>
    %28 = arith.subf %24, %27 : vector<8x8xf32>
    %29 = math.exp %28 : vector<8x8xf32>
    %cst_20 = arith.constant dense<0.000000e+00> : vector<8xf32>
    %30 = vector.multi_reduction <add>, %29, %cst_20 [0] : vector<8x8xf32> to vector<8xf32>
    %31 = vector.shape_cast %30 : vector<8xf32> to vector<1x8xf32>
    %32 = tpu.reciprocal %31 {approx = true} : vector<1x8xf32> -> vector<1x8xf32>
    %33 = vector.broadcast %32 : vector<1x8xf32> to vector<8x8xf32>
    %34 = arith.mulf %29, %33 : vector<8x8xf32>
    %35 = arith.truncf %34 : vector<8x8xf32> to vector<8x8xbf16>
    %36 = vector.extract_strided_slice %14 {offsets = [0, 0], sizes = [8, 16], strides = [1, 1]} : vector<8x32xf32> to vector<8x16xf32>
    %37 = arith.truncf %36 : vector<8x16xf32> to vector<8x16xbf16>
    %cst_21 = arith.constant dense<0.000000e+00> : vector<8x16xf32>
    %38 = tpu.matmul %35, %37, %cst_21 {dimension_numbers = #tpu.dot_dimension_numbers<[1], [0], [0], [1], [0, 0, 1, 1], [], []>} : vector<8x8xbf16>, vector<8x16xbf16>, vector<8x16xf32> -> vector<8x16xf32>
    %39 = arith.truncf %38 : vector<8x16xf32> to vector<8x16xbf16>
    %40 = vector.extract_strided_slice %7 {offsets = [0, 0], sizes = [16, 32], strides = [1, 1]} : vector<32x32xbf16> to vector<16x32xbf16>
    %cst_22 = arith.constant dense<0.000000e+00> : vector<8x32xf32>
    %41 = tpu.matmul %39, %40, %cst_22 {dimension_numbers = #tpu.dot_dimension_numbers<[1], [0], [0], [1], [0, 0, 1, 1], [], []>} : vector<8x16xbf16>, vector<16x32xbf16>, vector<8x32xf32> -> vector<8x32xf32>
    %42 = vector.broadcast %8 : vector<1x32xf32> to vector<8x32xf32>
    %43 = arith.addf %42, %41 : vector<8x32xf32>
    %44 = vector.extract_strided_slice %10 {offsets = [0, 16], sizes = [8, 16], strides = [1, 1]} : vector<8x32xf32> to vector<8x16xf32>
    %45 = arith.truncf %44 : vector<8x16xf32> to vector<8x16xbf16>
    %46 = vector.extract_strided_slice %12 {offsets = [0, 16], sizes = [8, 16], strides = [1, 1]} : vector<8x32xf32> to vector<8x16xf32>
    %47 = arith.truncf %46 : vector<8x16xf32> to vector<8x16xbf16>
    %cst_23 = arith.constant dense<0.000000e+00> : vector<8x8xf32>
    %48 = tpu.matmul %45, %47, %cst_23 {dimension_numbers = #tpu.dot_dimension_numbers<[1], [1], [0], [0], [0, 0, 1, 0], [], []>} : vector<8x16xbf16>, vector<8x16xbf16>, vector<8x8xf32> -> vector<8x8xf32>
    %cst_24 = arith.constant 0xFF800000 : f32
    %49 = vector.broadcast %cst_24 : f32 to vector<8x8xf32>
    %50 = arith.select %17, %48, %49 : vector<8x8xi1>, vector<8x8xf32>
    %cst_25 = arith.constant dense<0xFF800000> : vector<8xf32>
    %51 = vector.multi_reduction <maximumf>, %50, %cst_25 [0] : vector<8x8xf32> to vector<8xf32>
    %52 = vector.shape_cast %51 : vector<8xf32> to vector<1x8xf32>
    %53 = vector.broadcast %52 : vector<1x8xf32> to vector<8x8xf32>
    %54 = arith.subf %50, %53 : vector<8x8xf32>
    %55 = math.exp %54 : vector<8x8xf32>
    %cst_26 = arith.constant dense<0.000000e+00> : vector<8xf32>
    %56 = vector.multi_reduction <add>, %55, %cst_26 [0] : vector<8x8xf32> to vector<8xf32>
    %57 = vector.shape_cast %56 : vector<8xf32> to vector<1x8xf32>
    %58 = tpu.reciprocal %57 {approx = true} : vector<1x8xf32> -> vector<1x8xf32>
    %59 = vector.broadcast %58 : vector<1x8xf32> to vector<8x8xf32>
    %60 = arith.mulf %55, %59 : vector<8x8xf32>
    %61 = arith.truncf %60 : vector<8x8xf32> to vector<8x8xbf16>
    %62 = vector.extract_strided_slice %14 {offsets = [0, 16], sizes = [8, 16], strides = [1, 1]} : vector<8x32xf32> to vector<8x16xf32>
    %63 = arith.truncf %62 : vector<8x16xf32> to vector<8x16xbf16>
    %cst_27 = arith.constant dense<0.000000e+00> : vector<8x16xf32>
    %64 = tpu.matmul %61, %63, %cst_27 {dimension_numbers = #tpu.dot_dimension_numbers<[1], [0], [0], [1], [0, 0, 1, 1], [], []>} : vector<8x8xbf16>, vector<8x16xbf16>, vector<8x16xf32> -> vector<8x16xf32>
    %65 = arith.truncf %64 : vector<8x16xf32> to vector<8x16xbf16>
    %66 = vector.extract_strided_slice %7 {offsets = [16, 0], sizes = [16, 32], strides = [1, 1]} : vector<32x32xbf16> to vector<16x32xbf16>
    %cst_28 = arith.constant dense<0.000000e+00> : vector<8x32xf32>
    %67 = tpu.matmul %65, %66, %cst_28 {dimension_numbers = #tpu.dot_dimension_numbers<[1], [0], [0], [1], [0, 0, 1, 1], [], []>} : vector<8x16xbf16>, vector<16x32xbf16>, vector<8x32xf32> -> vector<8x32xf32>
    %68 = arith.addf %43, %67 : vector<8x32xf32>
    %c0_29 = arith.constant 0 : index
    %c0_30 = arith.constant 0 : index
    %69 = vector.load %arg8[%c0_29, %c0_30] : memref<1x32xf32, #tpu.memory_space<vmem>>, vector<1x32xf32>
    %c0_31 = arith.constant 0 : index
    %c0_32 = arith.constant 0 : index
    %70 = vector.load %arg9[%c0_31, %c0_32] : memref<1x32xf32, #tpu.memory_space<vmem>>, vector<1x32xf32>
    %71 = arith.addf %68, %1 : vector<8x32xf32>
    %cst_33 = arith.constant dense<0.000000e+00> : vector<8xf32>
    %72 = vector.multi_reduction <add>, %71, %cst_33 [1] : vector<8x32xf32> to vector<8xf32>
    %73 = vector.shape_cast %72 : vector<8xf32> to vector<8x1xf32>
    %cst_34 = arith.constant 3.200000e+01 : f32
    %74 = vector.broadcast %cst_34 : f32 to vector<8x1xf32>
    %75 = arith.divf %73, %74 : vector<8x1xf32>
    %76 = vector.broadcast %75 : vector<8x1xf32> to vector<8x32xf32>
    %77 = arith.subf %71, %76 : vector<8x32xf32>
    %78 = arith.mulf %77, %77 : vector<8x32xf32>
    %cst_35 = arith.constant dense<0.000000e+00> : vector<8xf32>
    %79 = vector.multi_reduction <add>, %78, %cst_35 [1] : vector<8x32xf32> to vector<8xf32>
    %80 = vector.shape_cast %79 : vector<8xf32> to vector<8x1xf32>
    %cst_36 = arith.constant 3.200000e+01 : f32
    %81 = vector.broadcast %cst_36 : f32 to vector<8x1xf32>
    %82 = arith.divf %80, %81 : vector<8x1xf32>
    %83 = vector.broadcast %75 : vector<8x1xf32> to vector<8x32xf32>
    %84 = arith.subf %71, %83 : vector<8x32xf32>
    %cst_37 = arith.constant 9.99999974E-6 : f32
    %85 = vector.broadcast %cst_37 : f32 to vector<8x1xf32>
    %86 = arith.addf %82, %85 : vector<8x1xf32>
    %87 = math.rsqrt %86 : vector<8x1xf32>
    %88 = vector.broadcast %87 : vector<8x1xf32> to vector<8x32xf32>
    %89 = arith.mulf %84, %88 : vector<8x32xf32>
    %90 = vector.broadcast %69 : vector<1x32xf32> to vector<8x32xf32>
    %91 = arith.mulf %89, %90 : vector<8x32xf32>
    %92 = vector.broadcast %70 : vector<1x32xf32> to vector<8x32xf32>
    %93 = arith.addf %91, %92 : vector<8x32xf32>
    %c0_38 = arith.constant 0 : index
    %c0_39 = arith.constant 0 : index
    %94 = vector.load %arg10[%c0_38, %c0_39] : memref<32x32xbf16, #tpu.memory_space<vmem>>, vector<32x32xbf16>
    %c0_40 = arith.constant 0 : index
    %c0_41 = arith.constant 0 : index
    %95 = vector.load %arg11[%c0_40, %c0_41] : memref<32x32xbf16, #tpu.memory_space<vmem>>, vector<32x32xbf16>
    %c0_42 = arith.constant 0 : index
    %c0_43 = arith.constant 0 : index
    %96 = vector.load %arg12[%c0_42, %c0_43] : memref<32x32xbf16, #tpu.memory_space<vmem>>, vector<32x32xbf16>
    %c0_44 = arith.constant 0 : index
    %c0_45 = arith.constant 0 : index
    %97 = vector.load %arg13[%c0_44, %c0_45] : memref<32x32xbf16, #tpu.memory_space<vmem>>, vector<32x32xbf16>
    %c0_46 = arith.constant 0 : index
    %c0_47 = arith.constant 0 : index
    %98 = vector.load %arg14[%c0_46, %c0_47] : memref<1x32xf32, #tpu.memory_space<vmem>>, vector<1x32xf32>
    %99 = arith.truncf %93 : vector<8x32xf32> to vector<8x32xbf16>
    %cst_48 = arith.constant dense<0.000000e+00> : vector<8x32xf32>
    %100 = tpu.matmul %99, %94, %cst_48 {dimension_numbers = #tpu.dot_dimension_numbers<[1], [0], [0], [1], [0, 0, 1, 1], [], []>} : vector<8x32xbf16>, vector<32x32xbf16>, vector<8x32xf32> -> vector<8x32xf32>
    %101 = arith.truncf %3 : vector<8x32xf32> to vector<8x32xbf16>
    %cst_49 = arith.constant dense<0.000000e+00> : vector<8x32xf32>
    %102 = tpu.matmul %101, %95, %cst_49 {dimension_numbers = #tpu.dot_dimension_numbers<[1], [0], [0], [1], [0, 0, 1, 1], [], []>} : vector<8x32xbf16>, vector<32x32xbf16>, vector<8x32xf32> -> vector<8x32xf32>
    %103 = arith.truncf %3 : vector<8x32xf32> to vector<8x32xbf16>
    %cst_50 = arith.constant dense<0.000000e+00> : vector<8x32xf32>
    %104 = tpu.matmul %103, %96, %cst_50 {dimension_numbers = #tpu.dot_dimension_numbers<[1], [0], [0], [1], [0, 0, 1, 1], [], []>} : vector<8x32xbf16>, vector<32x32xbf16>, vector<8x32xf32> -> vector<8x32xf32>
    %105 = vector.extract_strided_slice %100 {offsets = [0, 0], sizes = [8, 16], strides = [1, 1]} : vector<8x32xf32> to vector<8x16xf32>
    %106 = arith.truncf %105 : vector<8x16xf32> to vector<8x16xbf16>
    %107 = vector.extract_strided_slice %102 {offsets = [0, 0], sizes = [8, 16], strides = [1, 1]} : vector<8x32xf32> to vector<8x16xf32>
    %108 = arith.truncf %107 : vector<8x16xf32> to vector<8x16xbf16>
    %cst_51 = arith.constant dense<0.000000e+00> : vector<8x8xf32>
    %109 = tpu.matmul %106, %108, %cst_51 {dimension_numbers = #tpu.dot_dimension_numbers<[1], [1], [0], [0], [0, 0, 1, 0], [], []>} : vector<8x16xbf16>, vector<8x16xbf16>, vector<8x8xf32> -> vector<8x8xf32>
    %cst_52 = arith.constant dense<0xFF800000> : vector<8xf32>
    %110 = vector.multi_reduction <maximumf>, %109, %cst_52 [0] : vector<8x8xf32> to vector<8xf32>
    %111 = vector.shape_cast %110 : vector<8xf32> to vector<1x8xf32>
    %112 = vector.broadcast %111 : vector<1x8xf32> to vector<8x8xf32>
    %113 = arith.subf %109, %112 : vector<8x8xf32>
    %114 = math.exp %113 : vector<8x8xf32>
    %cst_53 = arith.constant dense<0.000000e+00> : vector<8xf32>
    %115 = vector.multi_reduction <add>, %114, %cst_53 [0] : vector<8x8xf32> to vector<8xf32>
    %116 = vector.shape_cast %115 : vector<8xf32> to vector<1x8xf32>
    %117 = tpu.reciprocal %116 {approx = true} : vector<1x8xf32> -> vector<1x8xf32>
    %118 = vector.broadcast %117 : vector<1x8xf32> to vector<8x8xf32>
    %119 = arith.mulf %114, %118 : vector<8x8xf32>
    %120 = arith.truncf %119 : vector<8x8xf32> to vector<8x8xbf16>
    %121 = vector.extract_strided_slice %104 {offsets = [0, 0], sizes = [8, 16], strides = [1, 1]} : vector<8x32xf32> to vector<8x16xf32>
    %122 = arith.truncf %121 : vector<8x16xf32> to vector<8x16xbf16>
    %cst_54 = arith.constant dense<0.000000e+00> : vector<8x16xf32>
    %123 = tpu.matmul %120, %122, %cst_54 {dimension_numbers = #tpu.dot_dimension_numbers<[1], [0], [0], [1], [0, 0, 1, 1], [], []>} : vector<8x8xbf16>, vector<8x16xbf16>, vector<8x16xf32> -> vector<8x16xf32>
    %124 = arith.truncf %123 : vector<8x16xf32> to vector<8x16xbf16>
    %125 = vector.extract_strided_slice %97 {offsets = [0, 0], sizes = [16, 32], strides = [1, 1]} : vector<32x32xbf16> to vector<16x32xbf16>
    %cst_55 = arith.constant dense<0.000000e+00> : vector<8x32xf32>
    %126 = tpu.matmul %124, %125, %cst_55 {dimension_numbers = #tpu.dot_dimension_numbers<[1], [0], [0], [1], [0, 0, 1, 1], [], []>} : vector<8x16xbf16>, vector<16x32xbf16>, vector<8x32xf32> -> vector<8x32xf32>
    %127 = vector.broadcast %98 : vector<1x32xf32> to vector<8x32xf32>
    %128 = arith.addf %127, %126 : vector<8x32xf32>
    %129 = vector.extract_strided_slice %100 {offsets = [0, 16], sizes = [8, 16], strides = [1, 1]} : vector<8x32xf32> to vector<8x16xf32>
    %130 = arith.truncf %129 : vector<8x16xf32> to vector<8x16xbf16>
    %131 = vector.extract_strided_slice %102 {offsets = [0, 16], sizes = [8, 16], strides = [1, 1]} : vector<8x32xf32> to vector<8x16xf32>
    %132 = arith.truncf %131 : vector<8x16xf32> to vector<8x16xbf16>
    %cst_56 = arith.constant dense<0.000000e+00> : vector<8x8xf32>
    %133 = tpu.matmul %130, %132, %cst_56 {dimension_numbers = #tpu.dot_dimension_numbers<[1], [1], [0], [0], [0, 0, 1, 0], [], []>} : vector<8x16xbf16>, vector<8x16xbf16>, vector<8x8xf32> -> vector<8x8xf32>
    %cst_57 = arith.constant dense<0xFF800000> : vector<8xf32>
    %134 = vector.multi_reduction <maximumf>, %133, %cst_57 [0] : vector<8x8xf32> to vector<8xf32>
    %135 = vector.shape_cast %134 : vector<8xf32> to vector<1x8xf32>
    %136 = vector.broadcast %135 : vector<1x8xf32> to vector<8x8xf32>
    %137 = arith.subf %133, %136 : vector<8x8xf32>
    %138 = math.exp %137 : vector<8x8xf32>
    %cst_58 = arith.constant dense<0.000000e+00> : vector<8xf32>
    %139 = vector.multi_reduction <add>, %138, %cst_58 [0] : vector<8x8xf32> to vector<8xf32>
    %140 = vector.shape_cast %139 : vector<8xf32> to vector<1x8xf32>
    %141 = tpu.reciprocal %140 {approx = true} : vector<1x8xf32> -> vector<1x8xf32>
    %142 = vector.broadcast %141 : vector<1x8xf32> to vector<8x8xf32>
    %143 = arith.mulf %138, %142 : vector<8x8xf32>
    %144 = arith.truncf %143 : vector<8x8xf32> to vector<8x8xbf16>
    %145 = vector.extract_strided_slice %104 {offsets = [0, 16], sizes = [8, 16], strides = [1, 1]} : vector<8x32xf32> to vector<8x16xf32>
    %146 = arith.truncf %145 : vector<8x16xf32> to vector<8x16xbf16>
    %cst_59 = arith.constant dense<0.000000e+00> : vector<8x16xf32>
    %147 = tpu.matmul %144, %146, %cst_59 {dimension_numbers = #tpu.dot_dimension_numbers<[1], [0], [0], [1], [0, 0, 1, 1], [], []>} : vector<8x8xbf16>, vector<8x16xbf16>, vector<8x16xf32> -> vector<8x16xf32>
    %148 = arith.truncf %147 : vector<8x16xf32> to vector<8x16xbf16>
    %149 = vector.extract_strided_slice %97 {offsets = [16, 0], sizes = [16, 32], strides = [1, 1]} : vector<32x32xbf16> to vector<16x32xbf16>
    %cst_60 = arith.constant dense<0.000000e+00> : vector<8x32xf32>
    %150 = tpu.matmul %148, %149, %cst_60 {dimension_numbers = #tpu.dot_dimension_numbers<[1], [0], [0], [1], [0, 0, 1, 1], [], []>} : vector<8x16xbf16>, vector<16x32xbf16>, vector<8x32xf32> -> vector<8x32xf32>
    %151 = arith.addf %128, %150 : vector<8x32xf32>
    %c0_61 = arith.constant 0 : index
    %c0_62 = arith.constant 0 : index
    %152 = vector.load %arg15[%c0_61, %c0_62] : memref<1x32xf32, #tpu.memory_space<vmem>>, vector<1x32xf32>
    %c0_63 = arith.constant 0 : index
    %c0_64 = arith.constant 0 : index
    %153 = vector.load %arg16[%c0_63, %c0_64] : memref<1x32xf32, #tpu.memory_space<vmem>>, vector<1x32xf32>
    %154 = arith.addf %151, %93 : vector<8x32xf32>
    %cst_65 = arith.constant dense<0.000000e+00> : vector<8xf32>
    %155 = vector.multi_reduction <add>, %154, %cst_65 [1] : vector<8x32xf32> to vector<8xf32>
    %156 = vector.shape_cast %155 : vector<8xf32> to vector<8x1xf32>
    %cst_66 = arith.constant 3.200000e+01 : f32
    %157 = vector.broadcast %cst_66 : f32 to vector<8x1xf32>
    %158 = arith.divf %156, %157 : vector<8x1xf32>
    %159 = vector.broadcast %158 : vector<8x1xf32> to vector<8x32xf32>
    %160 = arith.subf %154, %159 : vector<8x32xf32>
    %161 = arith.mulf %160, %160 : vector<8x32xf32>
    %cst_67 = arith.constant dense<0.000000e+00> : vector<8xf32>
    %162 = vector.multi_reduction <add>, %161, %cst_67 [1] : vector<8x32xf32> to vector<8xf32>
    %163 = vector.shape_cast %162 : vector<8xf32> to vector<8x1xf32>
    %cst_68 = arith.constant 3.200000e+01 : f32
    %164 = vector.broadcast %cst_68 : f32 to vector<8x1xf32>
    %165 = arith.divf %163, %164 : vector<8x1xf32>
    %166 = vector.broadcast %158 : vector<8x1xf32> to vector<8x32xf32>
    %167 = arith.subf %154, %166 : vector<8x32xf32>
    %cst_69 = arith.constant 9.99999974E-6 : f32
    %168 = vector.broadcast %cst_69 : f32 to vector<8x1xf32>
    %169 = arith.addf %165, %168 : vector<8x1xf32>
    %170 = math.rsqrt %169 : vector<8x1xf32>
    %171 = vector.broadcast %170 : vector<8x1xf32> to vector<8x32xf32>
    %172 = arith.mulf %167, %171 : vector<8x32xf32>
    %173 = vector.broadcast %152 : vector<1x32xf32> to vector<8x32xf32>
    %174 = arith.mulf %172, %173 : vector<8x32xf32>
    %175 = vector.broadcast %153 : vector<1x32xf32> to vector<8x32xf32>
    %176 = arith.addf %174, %175 : vector<8x32xf32>
    %c0_70 = arith.constant 0 : index
    %c0_71 = arith.constant 0 : index
    %177 = vector.load %arg17[%c0_70, %c0_71] : memref<32x64xbf16, #tpu.memory_space<vmem>>, vector<32x64xbf16>
    %c0_72 = arith.constant 0 : index
    %c0_73 = arith.constant 0 : index
    %178 = vector.load %arg18[%c0_72, %c0_73] : memref<1x64xf32, #tpu.memory_space<vmem>>, vector<1x64xf32>
    %c0_74 = arith.constant 0 : index
    %c0_75 = arith.constant 0 : index
    %179 = vector.load %arg19[%c0_74, %c0_75] : memref<64x32xbf16, #tpu.memory_space<vmem>>, vector<64x32xbf16>
    %c0_76 = arith.constant 0 : index
    %c0_77 = arith.constant 0 : index
    %180 = vector.load %arg20[%c0_76, %c0_77] : memref<1x32xf32, #tpu.memory_space<vmem>>, vector<1x32xf32>
    %181 = arith.truncf %176 : vector<8x32xf32> to vector<8x32xbf16>
    %cst_78 = arith.constant dense<0.000000e+00> : vector<8x64xf32>
    %182 = tpu.matmul %181, %177, %cst_78 {dimension_numbers = #tpu.dot_dimension_numbers<[1], [0], [0], [1], [0, 0, 1, 1], [], []>} : vector<8x32xbf16>, vector<32x64xbf16>, vector<8x64xf32> -> vector<8x64xf32>
    %183 = vector.broadcast %178 : vector<1x64xf32> to vector<8x64xf32>
    %184 = arith.addf %182, %183 : vector<8x64xf32>
    %cst_79 = arith.constant 0.000000e+00 : f32
    %185 = vector.broadcast %cst_79 : f32 to vector<8x64xf32>
    %186 = arith.maximumf %184, %185 : vector<8x64xf32>
    %187 = arith.truncf %186 : vector<8x64xf32> to vector<8x64xbf16>
    %cst_80 = arith.constant dense<0.000000e+00> : vector<8x32xf32>
    %188 = tpu.matmul %187, %179, %cst_80 {dimension_numbers = #tpu.dot_dimension_numbers<[1], [0], [0], [1], [0, 0, 1, 1], [], []>} : vector<8x64xbf16>, vector<64x32xbf16>, vector<8x32xf32> -> vector<8x32xf32>
    %189 = vector.broadcast %180 : vector<1x32xf32> to vector<8x32xf32>
    %190 = arith.addf %188, %189 : vector<8x32xf32>
    %c0_81 = arith.constant 0 : index
    %c0_82 = arith.constant 0 : index
    %191 = vector.load %arg21[%c0_81, %c0_82] : memref<1x32xf32, #tpu.memory_space<vmem>>, vector<1x32xf32>
    %c0_83 = arith.constant 0 : index
    %c0_84 = arith.constant 0 : index
    %192 = vector.load %arg22[%c0_83, %c0_84] : memref<1x32xf32, #tpu.memory_space<vmem>>, vector<1x32xf32>
    %193 = arith.addf %190, %176 : vector<8x32xf32>
    %cst_85 = arith.constant dense<0.000000e+00> : vector<8xf32>
    %194 = vector.multi_reduction <add>, %193, %cst_85 [1] : vector<8x32xf32> to vector<8xf32>
    %195 = vector.shape_cast %194 : vector<8xf32> to vector<8x1xf32>
    %cst_86 = arith.constant 3.200000e+01 : f32
    %196 = vector.broadcast %cst_86 : f32 to vector<8x1xf32>
    %197 = arith.divf %195, %196 : vector<8x1xf32>
    %198 = vector.broadcast %197 : vector<8x1xf32> to vector<8x32xf32>
    %199 = arith.subf %193, %198 : vector<8x32xf32>
    %200 = arith.mulf %199, %199 : vector<8x32xf32>
    %cst_87 = arith.constant dense<0.000000e+00> : vector<8xf32>
    %201 = vector.multi_reduction <add>, %200, %cst_87 [1] : vector<8x32xf32> to vector<8xf32>
    %202 = vector.shape_cast %201 : vector<8xf32> to vector<8x1xf32>
    %cst_88 = arith.constant 3.200000e+01 : f32
    %203 = vector.broadcast %cst_88 : f32 to vector<8x1xf32>
    %204 = arith.divf %202, %203 : vector<8x1xf32>
    %205 = vector.broadcast %197 : vector<8x1xf32> to vector<8x32xf32>
    %206 = arith.subf %193, %205 : vector<8x32xf32>
    %cst_89 = arith.constant 9.99999974E-6 : f32
    %207 = vector.broadcast %cst_89 : f32 to vector<8x1xf32>
    %208 = arith.addf %204, %207 : vector<8x1xf32>
    %209 = math.rsqrt %208 : vector<8x1xf32>
    %210 = vector.broadcast %209 : vector<8x1xf32> to vector<8x32xf32>
    %211 = arith.mulf %206, %210 : vector<8x32xf32>
    %212 = vector.broadcast %191 : vector<1x32xf32> to vector<8x32xf32>
    %213 = arith.mulf %211, %212 : vector<8x32xf32>
    %214 = vector.broadcast %192 : vector<1x32xf32> to vector<8x32xf32>
    %215 = arith.addf %213, %214 : vector<8x32xf32>
    %c0_90 = arith.constant 0 : index
    %c0_91 = arith.constant 0 : index
    %c0_92 = arith.constant 0 : index
    %216 = vector.load %arg23[%c0_90, %c0_91, %c0_92] : memref<1x8x32xf32, #tpu.memory_space<vmem>>, vector<1x8x32xf32>
    %217 = vector.shape_cast %216 : vector<1x8x32xf32> to vector<8x32xf32>
    %218 = vector.shape_cast %215 : vector<8x32xf32> to vector<1x8x32xf32>
    tpu.vector_store %arg23[%c0_90, %c0_91, %c0_92], %218 {strides = array<i32>} : memref<1x8x32xf32, #tpu.memory_space<vmem>>, vector<1x8x32xf32>,
    return
  }
  func.func @transform_0(%arg0: i32) -> (i32, i32, i32) {
    %c0_i32 = arith.constant 0 : i32
    %c0_i32_0 = arith.constant 0 : i32
    %c0_i32_1 = arith.constant 0 : i32
    return %arg0, %c0_i32, %c0_i32_0 : i32, i32, i32
  }
  func.func @transform_1(%arg0: i32) -> (i32, i32, i32) {
    %c0_i32 = arith.constant 0 : i32
    %c0_i32_0 = arith.constant 0 : i32
    %c0_i32_1 = arith.constant 0 : i32
    return %arg0, %c0_i32, %c0_i32_0 : i32, i32, i32
  }
  func.func @transform_2(%arg0: i32) -> (i32, i32) {
    %c0_i32 = arith.constant 0 : i32
    %c0_i32_0 = arith.constant 0 : i32
    %c0_i32_1 = arith.constant 0 : i32
    return %c0_i32, %c0_i32_0 : i32, i32
  }
  func.func @transform_3(%arg0: i32) -> (i32, i32) {
    %c0_i32 = arith.constant 0 : i32
    %c0_i32_0 = arith.constant 0 : i32
    %c0_i32_1 = arith.constant 0 : i32
    return %c0_i32, %c0_i32_0 : i32, i32
  }
  func.func @transform_4(%arg0: i32) -> (i32, i32) {
    %c0_i32 = arith.constant 0 : i32
    %c0_i32_0 = arith.constant 0 : i32
    %c0_i32_1 = arith.constant 0 : i32
    return %c0_i32, %c0_i32_0 : i32, i32
  }
  func.func @transform_5(%arg0: i32) -> (i32, i32) {
    %c0_i32 = arith.constant 0 : i32
    %c0_i32_0 = arith.constant 0 : i32
    %c0_i32_1 = arith.constant 0 : i32
    return %c0_i32, %c0_i32_0 : i32, i32
  }
  func.func @transform_6(%arg0: i32) -> (i32, i32) {
    %c0_i32 = arith.constant 0 : i32
    %c0_i32_0 = arith.constant 0 : i32
    %c0_i32_1 = arith.constant 0 : i32
    return %c0_i32, %c0_i32_0 : i32, i32
  }
  func.func @transform_7(%arg0: i32) -> (i32, i32) {
    %c0_i32 = arith.constant 0 : i32
    %c0_i32_0 = arith.constant 0 : i32
    %c0_i32_1 = arith.constant 0 : i32
    return %c0_i32, %c0_i32_0 : i32, i32
  }
  func.func @transform_8(%arg0: i32) -> (i32, i32) {
    %c0_i32 = arith.constant 0 : i32
    %c0_i32_0 = arith.constant 0 : i32
    %c0_i32_1 = arith.constant 0 : i32
    return %c0_i32, %c0_i32_0 : i32, i32
  }
  func.func @transform_9(%arg0: i32) -> (i32, i32) {
    %c0_i32 = arith.constant 0 : i32
    %c0_i32_0 = arith.constant 0 : i32
    %c0_i32_1 = arith.constant 0 : i32
    return %c0_i32, %c0_i32_0 : i32, i32
  }
  func.func @transform_10(%arg0: i32) -> (i32, i32) {
    %c0_i32 = arith.constant 0 : i32
    %c0_i32_0 = arith.constant 0 : i32
    %c0_i32_1 = arith.constant 0 : i32
    return %c0_i32, %c0_i32_0 : i32, i32
  }
  func.func @transform_11(%arg0: i32) -> (i32, i32) {
    %c0_i32 = arith.constant 0 : i32
    %c0_i32_0 = arith.constant 0 : i32
    %c0_i32_1 = arith.constant 0 : i32
    return %c0_i32, %c0_i32_0 : i32, i32
  }
  func.func @transform_12(%arg0: i32) -> (i32, i32) {
    %c0_i32 = arith.constant 0 : i32
    %c0_i32_0 = arith.constant 0 : i32
    %c0_i32_1 = arith.constant 0 : i32
    return %c0_i32, %c0_i32_0 : i32, i32
  }
  func.func @transform_13(%arg0: i32) -> (i32, i32) {
    %c0_i32 = arith.constant 0 : i32
    %c0_i32_0 = arith.constant 0 : i32
    %c0_i32_1 = arith.constant 0 : i32
    return %c0_i32, %c0_i32_0 : i32, i32
  }
  func.func @transform_14(%arg0: i32) -> (i32, i32) {
    %c0_i32 = arith.constant 0 : i32
    %c0_i32_0 = arith.constant 0 : i32
    %c0_i32_1 = arith.constant 0 : i32
    return %c0_i32, %c0_i32_0 : i32, i32
  }
  func.func @transform_15(%arg0: i32) -> (i32, i32) {
    %c0_i32 = arith.constant 0 : i32
    %c0_i32_0 = arith.constant 0 : i32
    %c0_i32_1 = arith.constant 0 : i32
    return %c0_i32, %c0_i32_0 : i32, i32
  }
  func.func @transform_16(%arg0: i32) -> (i32, i32) {
    %c0_i32 = arith.constant 0 : i32
    %c0_i32_0 = arith.constant 0 : i32
    %c0_i32_1 = arith.constant 0 : i32
    return %c0_i32, %c0_i32_0 : i32, i32
  }
  func.func @transform_17(%arg0: i32) -> (i32, i32) {
    %c0_i32 = arith.constant 0 : i32
    %c0_i32_0 = arith.constant 0 : i32
    %c0_i32_1 = arith.constant 0 : i32
    return %c0_i32, %c0_i32_0 : i32, i32
  }
  func.func @transform_18(%arg0: i32) -> (i32, i32) {
    %c0_i32 = arith.constant 0 : i32
    %c0_i32_0 = arith.constant 0 : i32
    %c0_i32_1 = arith.constant 0 : i32
    return %c0_i32, %c0_i32_0 : i32, i32
  }
  func.func @transform_19(%arg0: i32) -> (i32, i32) {
    %c0_i32 = arith.constant 0 : i32
    %c0_i32_0 = arith.constant 0 : i32
    %c0_i32_1 = arith.constant 0 : i32
    return %c0_i32, %c0_i32_0 : i32, i32
  }
  func.func @transform_20(%arg0: i32) -> (i32, i32) {
    %c0_i32 = arith.constant 0 : i32
    %c0_i32_0 = arith.constant 0 : i32
    %c0_i32_1 = arith.constant 0 : i32
    return %c0_i32, %c0_i32_0 : i32, i32
  }
  func.func @transform_21(%arg0: i32) -> (i32, i32) {
    %c0_i32 = arith.constant 0 : i32
    %c0_i32_0 = arith.constant 0 : i32
    %c0_i32_1 = arith.constant 0 : i32
    return %c0_i32, %c0_i32_0 : i32, i32
  }
  func.func @transform_22(%arg0: i32) -> (i32, i32, i32) {
    %c0_i32 = arith.constant 0 : i32
    %c0_i32_0 = arith.constant 0 : i32
    %c0_i32_1 = arith.constant 0 : i32
    return %arg0, %c0_i32, %c0_i32_0 : i32, i32, i32
  }
}

</mosaic_0001>

<bundles_post_ra>
// kernel: transformer_forward.9
= control target key start
LH: loop header
LB: loop body
LE: loop exit
PB: predicated region body
PF: predicated region fallthrough
CT: control target
= control target key end

     0   :  { %v143_v1 = vmov 0.0   ;;  %vm144_vm0 = vmmov 0   ;;  %s181_s0 = inlined_call_operand.vmem [shape: f32[2,32], index: 0, kind: input, shape index: {}]   ;;  %s182_s1 = inlined_call_operand.vmem [shape: bf16[32,11], index: 1, kind: input, shape index: {}]   ;;  %s183_s2 = inlined_call_operand.vmem [shape: f32[1,11], index: 2, kind: input, shape index: {}]   ;;  %s184_s3 = inlined_call_operand.hbm [shape: f32[2,11], index: 3, kind: output, shape index: {}]  }
   0x1   :  { %v119_v0 = vld [vmem:[%s182_s1 + $0x8] sm:$0xff]   ;;  %108 = vmatprep.subr.bf16.mxu0 %v143_v1  ;;  %v120_v2 = vld [vmem:[%s182_s1] sm:$0xff]   ;;  %112 = vmatprep.mubr.msk.bf16.mxu0 %vm144_vm0, %v143_v1 }
   0x2   :  { %109 = vmatpush3.bf16.msra.mxu0 %v119_v0  ;;  %v16_v3 = vld [vmem:[%s181_s0] sm:$0x3] }
   0x3   :  { %110 = vmatprep.subr.bf16.mxu0 %v143_v1 }
   0x4   :  { %8 = vsyncpa [#allocation3], 0  ;;  %v17_v4 = vpack.c.bf16 %v16_v3, %v16_v3  ;;  %vm41_vm1 = vcmask 261120   ;;  %v101_v5 = vld [vmem:[%s183_s2] ss:$0 sm:$0xff]  ;;  %s145_s20 = smov [#allocation2]  }
   0x5   :  { %s93_s21 = sshll.u32 %s145_s20, 4  ;;  %vm85_vm2 = vcmask 82944   ;;  %s94_s21 = int_to_ptr.vmem [resolvable:$true] %s93_s21 }
   0x6   :  { %111 = vmatpush3.bf16.msra.mxu0 %v120_v2  ;;  %s121_s0 = scalar_lea.vmem %s94_s21, 32  ;;  %p126_p1 = scmp.lt.s32.totalorder %s94_s21, %s94_s21 }
   0x7   :  { %p122_p0 = scmp.ne.s32.totalorder %s94_s21, %s121_s0  ;;  %p127_p2 = scmp.lt.s32.totalorder %s121_s0, %s121_s0 }
   0x9   :  { %113 = vmatmul.mubr.msk.bf16.vlgmr.msra.gmra.mxu0 %vm41_vm1, %v17_v4  ;;  %p128_p3 = por %p127_p2, %p126_p1 }
   0xb   :  { %p129_p4 = pnand %p128_p3, %p122_p0 }
  0xc9   :  { %v79_v6 = vpop.f32.mrf.mxu0 }
  0xca   :  { %v80_v7 = vadd.f32 %v101_v5, %v79_v6 }
  0xcb   :  { %v114_v8 = vpop.f32.mrf.mxu0 }
  0xcc   :  { %86 = vst.msk [vmem:[#allocation2] sm:$0x3] %vm85_vm2, %v80_v7 }
  0xcd   :  { %v82_v9 = vpop.f32.mrf.mxu0 }
  0xce   :  { %132 = shalt.err (!%p129_p4)
}
  0xcf   :  { %96 = dma.vmem_to_hbm [thread:$0]  %s94_s21, 32, %s184_s3, [#allocation3]   ;;  %v115_v10 = vpop.f32.mrf.mxu0 }
  0xd0   :  { %141 = dma.done.wait [#allocation3], 32  }
  0xd1   :  { %142 = vsyncadd [#allocation3], 4294967264 }
  0xd2   :  { %100 = vsyncpa [#allocation3], 1 }

// kernel: transformer_forward.5
= control target key start
LH: loop header
LB: loop body
LE: loop exit
PB: predicated region body
PF: predicated region fallthrough
CT: control target
= control target key end

     0   :  { %s1530_s29 = smov 0   ;;  %s1685_s0 = inlined_call_operand.vmem [shape: f32[2,8,32], index: 0, kind: input, shape index: {}]   ;;  %s1686_s1 = inlined_call_operand.vmem [shape: bf16[32,32], index: 1, kind: input, shape index: {}]   ;;  %s1687_s2 = inlined_call_operand.vmem [shape: bf16[32,32], index: 2, kind: input, shape index: {}]   ;;  %s1688_s3 = inlined_call_operand.vmem [shape: bf16[32,32], index: 3, kind: input, shape index: {}]   ;;  %s1689_s4 = inlined_call_operand.vmem [shape: bf16[32,32], index: 4, kind: input, shape index: {}]   ;;  %s1690_s5 = inlined_call_operand.vmem [shape: f32[1,32], index: 5, kind: input, shape index: {}]   ;;  %s1691_s6 = inlined_call_operand.vmem [shape: f32[1,32], index: 6, kind: input, shape index: {}]   ;;  %s1692_s7 = inlined_call_operand.vmem [shape: f32[1,32], index: 7, kind: input, shape index: {}]   ;;  %s1693_s8 = inlined_call_operand.vmem [shape: bf16[32,64], index: 8, kind: input, shape index: {}]   ;;  %s1694_s9 = inlined_call_operand.vmem [shape: f32[1,64], index: 9, kind: input, shape index: {}]   ;;  %s1695_s10 = inlined_call_operand.vmem [shape: bf16[64,32], index: 10, kind: input, shape index: {}]   ;;  %s1696_s11 = inlined_call_operand.vmem [shape: f32[1,32], index: 11, kind: input, shape index: {}]   ;;  %s1697_s12 = inlined_call_operand.vmem [shape: f32[1,32], index: 12, kind: input, shape index: {}]   ;;  %s1698_s13 = inlined_call_operand.vmem [shape: f32[1,32], index: 13, kind: input, shape index: {}]   ;;  %s1699_s14 = inlined_call_operand.vmem [shape: f32[2,8,32], index: 14, kind: output, shape index: {}]  }
   0x1 LB: > { %s1257_s30 = sadd.s32 4294967295, %s1450_s29   ;;  %p1261_p0 = scmp.ge.s32.totalorder %s1450_s29, 1  ;;  %s1450_s29 = sphi %s1530_s29, %s24_s29  }
   0x2   : > { %p411_p1 = scmp.lt.s32.totalorder %s1450_s29, 3 }
   0x4   : > { %p412_p2 = pnand %p1261_p0, %p411_p1 }
   0x5   : > { %p455_p3 = scmp.lt.s32.totalorder (!%p412_p2), %s1257_s30, 1  ;;  %s1454_s17 = smov (!%p412_p2), 112  }
   0x6   : > { %415 = sbr.rel (%p412_p2) target bundleno = 2156 (0x86c), region = 76 }
   0xb   : > { %v1418_v0 = vld [vmem:[%s1686_s1 + $0x8] sm:$0xff]   ;;  %v1452_v1 = vmov 0.0   ;;  %v1419_v2 = vld [vmem:[%s1686_s1] sm:$0xff]   ;;  %vm1453_vm0 = vmmov 0   ;;  %s1701_s30 = smov (!%p455_p3, %s1257_s30), 1  ;;  %vm495_vm1 = vcmask 261120  }
   0xc   : > { %1327 = vmatprep.subr.bf16.mxu1 %v1452_v1  ;;  %1343 = vmatprep.subr.bf16.mxu0 %v1452_v1  ;;  %s1262_s19 = sshll.u32 %s1701_s30, 3  ;;  %v1420_v3 = vld [vmem:[%s1687_s2 + $0x8] sm:$0xff]   ;;  %v1421_v6 = vld [vmem:[%s1687_s2] sm:$0xff]   ;;  %vm645_vm2 = vcmask 130048   ;;  %vm717_vm3 = vcmask 1043456   ;;  %vm692_vm4 = vcmask 64512  }
   0xd   : > { %1328 = vmatpush3.bf16.msra.mxu1 %v1418_v0  ;;  %1331 = vmatprep.mubr.msk.bf16.mxu1 %vm1453_vm0, %v1452_v1  ;;  %s458_s24 = scalar_lea.vmem %s1685_s0, %s1262_s19  ;;  %v1422_v7 = vld [vmem:[%s1688_s3 + $0x8] sm:$0xff]   ;;  %v1423_v8 = vld [vmem:[%s1688_s3] sm:$0xff]   ;;  %vm1129_vm5 = vcmask 523264   ;;  %s462_s25 = scalar_lea.vmem %s1699_s14, %s1262_s19 }
   0xe   : > { %1329 = vmatprep.subr.bf16.mxu1 %v1452_v1  ;;  %1347 = vmatprep.mubr.msk.bf16.mxu0 %vm1453_vm0, %v1452_v1  ;;  %v1563_v4 = vld [vmem:[%s458_s24] sm:$0xff] }
   0xf   : > { %v482_v5 = vpack.c.bf16 %v1563_v4, %v1563_v4  ;;  %1344 = vmatpush3.bf16.msra.mxu0 %v1422_v7  ;;  %v1424_v26 = vld [vmem:[%s1689_s4] sm:$0xff]  }
  0x10   : > { %1345 = vmatprep.subr.bf16.mxu0 %v1452_v1 }
  0x11   : > { %1330 = vmatpush3.bf16.msra.mxu1 %v1419_v2 }
  0x12   : > { %1335 = vmatprep.subr.bf16.mxu1 %v1452_v1 }
  0x13   : > { %1346 = vmatpush3.bf16.msra.mxu0 %v1423_v8 }
  0x14   : > { %1332 = vmatmul.mubr.msk.bf16.vlgmr.msra.gmra.mxu1 %vm495_vm1, %v482_v5  ;;  %1357 = vmatprep.subr.bf16.mxu0 %v1452_v1 }
  0x15   : > { %1336 = vmatpush3.bf16.msra.mxu1 %v1420_v3  ;;  %1339 = vmatprep.mubr.msk.bf16.mxu1 %vm1453_vm0, %v1452_v1 }
  0x16   : > { %1337 = vmatprep.subr.bf16.mxu1 %v1452_v1  ;;  %1348 = vmatmul.mubr.msk.bf16.vlgmr.msra.gmra.mxu0 %vm495_vm1, %v482_v5 }
  0x17   : > { %1359 = vmatprep.mubr.msk.bf16.mxu0 %vm1453_vm0, %v1452_v1 }
  0x19   : > { %1338 = vmatpush3.bf16.msra.mxu1 %v1421_v6 }
  0x1a   : > { %1351 = vmatprep.subr.bf16.mxu1 %v1452_v1 }
  0x1c   : > { %1340 = vmatmul.mubr.msk.bf16.vlgmr.msra.gmra.mxu1 %vm495_vm1, %v482_v5 }
  0x1d   : > { %1353 = vmatprep.mubr.msk.bf16.mxu1 %vm1453_vm0, %v1452_v1 }
  0xd4   : > { %v533_v9 = vpop.f32.mrf.mxu1 }
  0xd5   : > { %v643_v18 = vpack.c.bf16 %v533_v9, %v533_v9 }
  0xd6   : > { %v1333_v10 = vpop.f32.mrf.mxu1  ;;  %v637_v20 = vpop.f32.mrf.mxu0 }
  0xd7   : > { %v713_v21 = vpack.c.bf16 %v637_v20, %v637_v20 }
  0xd8   : > { %v536_v11 = vpop.f32.mrf.mxu1  ;;  %v1349_v22 = vpop.f32.mrf.mxu0 }
  0xd9   : > { %v719_v23 = vsel %vm717_vm3, %v713_v21, 0  ;;  %891 = vrot.lane.b32.xlu1 %v713_v21, %s1454_s17 }
  0xda   : > { %v1334_v12 = vpop.f32.mrf.mxu1  ;;  %v640_v24 = vpop.f32.mrf.mxu0  ;;  %1358 = vmatpush3.bf16.msra.mxu0 %v719_v23  ;;  %v1425_v23 = vld [vmem:[%s1689_s4 + $0x8] sm:$0xff]  }
  0xdb   : > { %1369 = vmatprep.subr.bf16.mxu0 %v1452_v1 }
  0xdc   : > { %v585_v13 = vpop.f32.mrf.mxu1  ;;  %v1350_v25 = vpop.f32.mrf.mxu0 }
  0xdd   : > { %v644_v14 = vpack.c.bf16 %v585_v13, %v585_v13 }
  0xde   : > { %v1341_v15 = vpop.f32.mrf.mxu1 }
  0xdf   : > { %v650_v16 = vsel %vm645_vm2, %v644_v14, 0  ;;  %822 = vrot.lane.b32.xlu0 %v644_v14, %s1454_s17 }
  0xe0   : > { %v588_v17 = vpop.f32.mrf.mxu1  ;;  %1352 = vmatpush3.bf16.xpose.msra.mxu1 %v650_v16 }
  0xe1   : > { %1363 = vmatprep.subr.bf16.mxu1 %v1452_v1 }
  0xe2   : > { %v1342_v19 = vpop.f32.mrf.mxu1 }
  0xe3   : > { %819 = vrot.lane.b32.xlu0 %v643_v18, %s1454_s17 }
  0xe7   : > { %1354 = vmatmul.mubr.msk.bf16.vlgmr.msra.gmra.mxu1 %vm645_vm2, %v643_v18 }
  0xe8   : > { %1365 = vmatprep.mubr.msk.bf16.mxu1 %vm1453_vm0, %v1452_v1  ;;  %1364 = vmatpush3.bf16.msra.mxu1 %v1424_v26 }
  0xe9   : > { %1375 = vmatprep.subr.bf16.mxu1 %v1452_v1 }
 0x14b   : > { %v892_v54 = vpop.permute.xlu1 %891 }
 0x14c   : > { %v897_v58 = vsel %vm717_vm3, %v892_v54, 0  ;;  %v1282_v54 = vld [vmem:[%s1691_s6] ss:$0 sm:$0xff] }
 0x151   : > { %v823_v50 = vpop.permute.xlu0 %822 }
 0x152   : > { %v828_v52 = vsel %vm645_vm2, %v823_v50, 0 }
 0x155   : > { %v820_v53 = vpop.permute.xlu0 %819 }
 0x1a7   : > { %v686_v27 = vpop.f32.mrf.mxu1 }
 0x1a8   : > { %v693_v28 = vsel %vm692_vm4, %v686_v27, -inf }
 0x1a9   : > { %v694_v29 = vrot.slane %v693_v28, 4  ;;  %v1355_v30 = vpop.f32.mrf.mxu1 }
 0x1ab   : > { %v695_v31 = vmax.f32 %v693_v28, %v694_v29  ;;  %v689_v32 = vpop.f32.mrf.mxu1 }
 0x1ad   : > { %v696_v33 = vrot.slane %v695_v31, 2  ;;  %v1356_v34 = vpop.f32.mrf.mxu1 }
 0x1af   : > { %v697_v35 = vmax.f32 %v695_v31, %v696_v33  ;;  %v1277_v33 = vld [vmem:[%s1690_s5] ss:$0 sm:$0xff] }
 0x1b1   : > { %v698_v36 = vrot.slane %v697_v35, 1 }
 0x1b3   : > { %v699_v37 = vmax.f32 %v697_v35, %v698_v36 }
 0x1b5   : > { %v700_v38 = vsub.f32 %v686_v27, %v699_v37 }
 0x1b7   : > { %v701_v39 = vmul.f32 1.442695, %v700_v38 }
 0x1b9   : > { %1432 = vpow2.f32 %v701_v39 }
 0x1c6   : > { %v1433_v40 = vpop.eup %1432 }
 0x1c7   : > { %v703_v41 = vsel %vm692_vm4, %v1433_v40, 0.0 }
 0x1c8   : > { %v704_v42 = vrot.slane %v703_v41, 4 }
 0x1ca   : > { %v705_v43 = vadd.f32 %v704_v42, %v703_v41 }
 0x1cc   : > { %v706_v44 = vrot.slane %v705_v43, 2 }
 0x1ce   : > { %v707_v45 = vadd.f32 %v706_v44, %v705_v43 }
 0x1d0   : > { %v708_v46 = vrot.slane %v707_v45, 1 }
 0x1d2   : > { %v709_v47 = vadd.f32 %v708_v46, %v707_v45 }
 0x1d4   : > { %1434 = vrcp.f32 %v709_v47  ;;  %v1426_v47 = vld [vmem:[%s1693_s8 + $0x8] sm:$0xff]  }
 0x1e1   : > { %v1435_v48 = vpop.eup %1434 }
 0x1e2   : > { %v711_v49 = vmul.f32 %v1435_v48, %v1433_v40  ;;  %v1428_v48 = vld [vmem:[%s1695_s10 + $0x18] sm:$0xff]  }
 0x1e4   : > { %v712_v51 = vpack.c.bf16 %v711_v49, %v711_v49  ;;  %v1429_v49 = vld [vmem:[%s1695_s10 + $0x10] sm:$0xff]  }
 0x1e6   : > { %1360 = vmatmul.mubr.msk.bf16.vlgmr.msra.gmra.mxu0 %vm692_vm4, %v712_v51 }
 0x1e7   : > { %1370 = vmatpush3.bf16.xpose.msra.mxu0 %v828_v52  ;;  %1371 = vmatprep.mubr.msk.bf16.mxu0 %vm1453_vm0, %v1452_v1 }
 0x1e8   : > { %1381 = vmatprep.subr.bf16.mxu0 %v1452_v1 }
 0x1ee   : > { %1372 = vmatmul.mubr.msk.bf16.vlgmr.msra.gmra.mxu0 %vm645_vm2, %v820_v53 }
 0x1ef   : > { %1383 = vmatprep.mubr.msk.bf16.mxu0 %vm1453_vm0, %v1452_v1  ;;  %1382 = vmatpush3.bf16.msra.mxu0 %v1425_v23 }
 0x1f0   : > { %1395 = vmatprep.subr.bf16.mxu0 %v1452_v1 }
 0x2a6   : > { %v755_v55 = vpop.f32.mrf.mxu0 }
 0x2a7   : > { %v761_v56 = vpack.c.bf16 %v755_v55, %v755_v55 }
 0x2a8   : > { %v1361_v57 = vpop.f32.mrf.mxu0 }
 0x2a9   : > { %1366 = vmatmul.mubr.msk.bf16.vlgmr.msra.gmra.mxu1 %vm645_vm2, %v761_v56  ;;  %v1283_v56 = vld [vmem:[%s1692_s7] ss:$0 sm:$0xff] }
 0x2aa   : > { %1376 = vmatpush3.bf16.msra.mxu1 %v897_v58  ;;  %v758_v59 = vpop.f32.mrf.mxu0  ;;  %1377 = vmatprep.mubr.msk.bf16.mxu1 %vm1453_vm0, %v1452_v1 }
 0x2ab   : > { %1387 = vmatprep.subr.bf16.mxu1 %v1452_v1 }
 0x2ac   : > { %v1362_v60 = vpop.f32.mrf.mxu0 }
 0x2ad   : > { %v1430_v60 = vld [vmem:[%s1695_s10 + $0x8] sm:$0xff]  }
 0x2ae   : > { %v864_v61 = vpop.f32.mrf.mxu0 }
 0x2af   : > { %v870_v62 = vsel %vm692_vm4, %v864_v61, -inf }
 0x2b0   : > { %v871_v63 = vrot.slane %v870_v62, 4  ;;  %v1373_v0 = vpop.f32.mrf.mxu0 }
 0x2b2   : > { %v872_v2 = vmax.f32 %v870_v62, %v871_v63  ;;  %v867_v3 = vpop.f32.mrf.mxu0  ;;  %v1284_v62 = vld [vmem:[%s1694_s9] ss:$0 sm:$0xff] }
 0x2b4   : > { %v873_v5 = vrot.slane %v872_v2, 2  ;;  %v1374_v6 = vpop.f32.mrf.mxu0 }
 0x2b6   : > { %v874_v7 = vmax.f32 %v872_v2, %v873_v5 }
 0x2b8   : > { %v875_v8 = vrot.slane %v874_v7, 1 }
 0x2ba   : > { %v876_v9 = vmax.f32 %v874_v7, %v875_v8 }
 0x2bc   : > { %v877_v10 = vsub.f32 %v864_v61, %v876_v9  ;;  %v1431_v61 = vld [vmem:[%s1695_s10] sm:$0xff]  }
 0x2be   : > { %v878_v11 = vmul.f32 1.442695, %v877_v10 }
 0x2c0   : > { %1436 = vpow2.f32 %v878_v11 }
 0x2cd   : > { %v1437_v12 = vpop.eup %1436 }
 0x2ce   : > { %v880_v13 = vsel %vm692_vm4, %v1437_v12, 0.0 }
 0x2cf   : > { %v881_v14 = vrot.slane %v880_v13, 4 }
 0x2d1   : > { %v882_v15 = vadd.f32 %v881_v14, %v880_v13 }
 0x2d3   : > { %v883_v16 = vrot.slane %v882_v15, 2 }
 0x2d5   : > { %v884_v17 = vadd.f32 %v883_v16, %v882_v15 }
 0x2d7   : > { %v885_v18 = vrot.slane %v884_v17, 1 }
 0x2d9   : > { %v886_v19 = vadd.f32 %v885_v18, %v884_v17 }
 0x2db   : > { %1438 = vrcp.f32 %v886_v19 }
 0x2e8   : > { %v1439_v20 = vpop.eup %1438 }
 0x2e9   : > { %v888_v21 = vmul.f32 %v1439_v20, %v1437_v12 }
 0x2eb   : > { %v889_v22 = vpack.c.bf16 %v888_v21, %v888_v21 }
 0x2ed   : > { %1378 = vmatmul.mubr.msk.bf16.vlgmr.msra.gmra.mxu1 %vm692_vm4, %v889_v22 }
 0x2ee   : > { %1391 = vmatprep.mubr.msk.bf16.mxu1 %vm1453_vm0, %v1452_v1  ;;  %1388 = vmatpush3.bf16.msra.mxu1 %v1426_v47 }
 0x2ef   : > { %1389 = vmatprep.subr.bf16.mxu1 %v1452_v1 }
 0x369   : > { %v805_v24 = vpop.f32.mrf.mxu1 }
 0x36a   : > { %v817_v34 = vadd.f32 %v1277_v33, %v805_v24  ;;  %v1294_v24 = vld [vmem:[%s1697_s12] ss:$0 sm:$0xff] }
 0x36b   : > { %v1367_v25 = vpop.f32.mrf.mxu1 }
 0x36d   : > { %v808_v26 = vpop.f32.mrf.mxu1 }
 0x36e   : > { %v1295_v26 = vld [vmem:[%s1698_s13] ss:$0 sm:$0xff] }
 0x36f   : > { %v1368_v27 = vpop.f32.mrf.mxu1 }
 0x3ad   : > { %v933_v28 = vpop.f32.mrf.mxu1 }
 0x3ae   : > { %v939_v29 = vpack.c.bf16 %v933_v28, %v933_v28 }
 0x3af   : > { %v1379_v30 = vpop.f32.mrf.mxu1 }
 0x3b0   : > { %1384 = vmatmul.mubr.msk.bf16.vlgmr.msra.gmra.mxu0 %vm645_vm2, %v939_v29 }
 0x3b1   : > { %v936_v31 = vpop.f32.mrf.mxu1  ;;  %1403 = vmatprep.mubr.msk.bf16.mxu0 %vm1453_vm0, %v1452_v1  ;;  %1396 = vmatpush3.bf16.msra.mxu0 %v1428_v48 }
 0x3b2   : > { %1397 = vmatprep.subr.bf16.mxu0 %v1452_v1 }
 0x3b3   : > { %v1380_v32 = vpop.f32.mrf.mxu1 }
 0x3b5   : > { %1398 = vmatpush3.bf16.msra.mxu0 %v1429_v49 }
 0x3b6   : > { %1399 = vmatprep.subr.bf16.mxu0 %v1452_v1 }
 0x3b9   : > { %1400 = vmatpush3.bf16.msra.mxu0 %v1430_v60 }
 0x3ba   : > { %1401 = vmatprep.subr.bf16.mxu0 %v1452_v1  ;;  %v1288_v1 = vld [vmem:[%s1696_s11] ss:$0 sm:$0xff] }
 0x3bd   : > { %1402 = vmatpush3.bf16.msra.mxu0 %v1431_v61 }
 0x470   : > { %v983_v35 = vpop.f32.mrf.mxu0 }
 0x471   : > { %v989_v36 = vadd.f32 %v983_v35, %v817_v34 }
 0x472   : > { %v1385_v37 = vpop.f32.mrf.mxu0 }
 0x473   : > { %v992_v38 = vadd.f32 %v989_v36, %v1563_v4  ;;  %v1427_v4 = vld [vmem:[%s1693_s8] sm:$0xff]  }
 0x474   : > { %v986_v39 = vpop.f32.mrf.mxu0  ;;  %1390 = vmatpush3.bf16.msra.mxu1 %v1427_v4 }
 0x475   : > { %v993_v40 = vsel %vm495_vm1, %v992_v38, 0.0 }
 0x476   : > { %994 = vadd.xlane.f32.xlu1 %v993_v40  ;;  %v1386_v41 = vpop.f32.mrf.mxu0 }
 0x4ff   : > { %v995_v42 = vpop.xlane.xlu1 %994 }
 0x500   : > { %v997_v43 = vmul.f32 0.03125, %v995_v42 }
 0x502   : > { %v998_v44 = vsub.f32 %v992_v38, %v997_v43 }
 0x504   : > { %v999_v45 = vmul.f32 %v998_v44, %v998_v44 }
 0x506   : > { %v1000_v46 = vsel %vm495_vm1, %v999_v45, 0.0 }
 0x507   : > { %1001 = vadd.xlane.f32.xlu0 %v1000_v46 }
 0x590   : > { %v1002_v50 = vpop.xlane.xlu0 %1001 }
 0x591   : > { %v1003_v51 = vmul.f32 0.03125, %v1002_v50 }
 0x593   : > { %v1004_v52 = vadd.f32 1e-05, %v1003_v51 }
 0x595   : > { %1440 = vrsqrt.f32 %v1004_v52 }
 0x5a2   : > { %v1441_v53 = vpop.eup %1440 }
 0x5a3   : > { %v1006_v55 = vmul.f32 %v1441_v53, %v998_v44 }
 0x5a5   : > { %v1013_v57 = vmul.f32 %v1282_v54, %v1006_v55 }
 0x5a7   : > { %v1020_v58 = vadd.f32 %v1283_v56, %v1013_v57 }
 0x5a9   : > { %v1035_v59 = vpack.c.bf16 %v1020_v58, %v1020_v58 }
 0x5ab   : > { %1392 = vmatmul.mubr.msk.bf16.vlgmr.msra.gmra.mxu1 %vm495_vm1, %v1035_v59 }
 0x66b   : > { %v1091_v63 = vpop.f32.mrf.mxu1 }
 0x66c   : > { %v1092_v0 = vadd.f32 %v1284_v62, %v1091_v63 }
 0x66d   : > { %v1393_v2 = vpop.f32.mrf.mxu1 }
 0x66e   : > { %v1097_v3 = vmax.f32 %v1092_v0, 0.0 }
 0x66f   : > { %v1094_v5 = vpop.f32.mrf.mxu1 }
 0x670   : > { %v1098_v6 = vpack.c.bf16 %v1097_v3, %v1097_v3 }
 0x671   : > { %v1394_v7 = vpop.f32.mrf.mxu1 }
 0x672   : > { %1404 = vmatmul.mubr.msk.bf16.vlgmr.msra.gmra.mxu0 %vm1129_vm5, %v1098_v6 }
 0x732   : > { %v1167_v8 = vpop.f32.mrf.mxu0 }
 0x733   : > { %v1168_v9 = vadd.f32 %v1288_v1, %v1167_v8 }
 0x734   : > { %v1405_v10 = vpop.f32.mrf.mxu0 }
 0x735   : > { %v1175_v11 = vadd.f32 %v1168_v9, %v1020_v58 }
 0x736   : > { %v1170_v12 = vpop.f32.mrf.mxu0 }
 0x737   : > { %v1176_v13 = vsel %vm495_vm1, %v1175_v11, 0.0 }
 0x738   : > { %1177 = vadd.xlane.f32.xlu0 %v1176_v13  ;;  %v1406_v14 = vpop.f32.mrf.mxu0 }
 0x7c1   : > { %v1178_v15 = vpop.xlane.xlu0 %1177 }
 0x7c2   : > { %v1179_v16 = vmul.f32 0.03125, %v1178_v15 }
 0x7c4   : > { %v1180_v17 = vsub.f32 %v1175_v11, %v1179_v16 }
 0x7c6   : > { %v1181_v18 = vmul.f32 %v1180_v17, %v1180_v17 }
 0x7c8   : > { %v1182_v19 = vsel %vm495_vm1, %v1181_v18, 0.0 }
 0x7c9   : > { %1183 = vadd.xlane.f32.xlu1 %v1182_v19 }
 0x852   : > { %v1184_v20 = vpop.xlane.xlu1 %1183 }
 0x853   : > { %v1185_v21 = vmul.f32 0.03125, %v1184_v20 }
 0x855   : > { %v1186_v22 = vadd.f32 1e-05, %v1185_v21 }
 0x857   : > { %1442 = vrsqrt.f32 %v1186_v22 }
 0x864   : > { %v1443_v23 = vpop.eup %1442 }
 0x865   : > { %v1188_v25 = vmul.f32 %v1443_v23, %v1180_v17 }
 0x867   : > { %v1195_v27 = vmul.f32 %v1294_v24, %v1188_v25 }
 0x869   : > { %v1202_v28 = vadd.f32 %v1295_v26, %v1195_v27 }
 0x86b   : > { %1203 = vst.msk [vmem:[%s462_s25] sm:$0xff] %vm495_vm1, %v1202_v28 }
 0x86c PF: > { %s24_s29 = sadd.s32 1, %s1450_s29  }
 0x86d   : > { %p21_p4 = scmp.ge.s32.totalorder %s24_s29, 4  }
 0x86f   :  { %23 = sbr.rel (!%p21_p4) target bundleno = 1 (0x1), region = 106 }

// kernel: transformer_forward.7
= control target key start
LH: loop header
LB: loop body
LE: loop exit
PB: predicated region body
PF: predicated region fallthrough
CT: control target
= control target key end

     0   :  { %s2749_s0 = inlined_call_operand.vmem [shape: f32[2,8,32], index: 0, kind: input, shape index: {}]   ;;  %s2750_s1 = inlined_call_operand.vmem [shape: f32[2,8,32], index: 1, kind: input, shape index: {}]   ;;  %s2751_s2 = inlined_call_operand.vmem [shape: bf16[32,32], index: 2, kind: input, shape index: {}]   ;;  %s2752_s3 = inlined_call_operand.vmem [shape: bf16[32,32], index: 3, kind: input, shape index: {}]   ;;  %s2753_s4 = inlined_call_operand.vmem [shape: bf16[32,32], index: 4, kind: input, shape index: {}]   ;;  %s2754_s5 = inlined_call_operand.vmem [shape: bf16[32,32], index: 5, kind: input, shape index: {}]   ;;  %s2755_s6 = inlined_call_operand.vmem [shape: f32[1,32], index: 6, kind: input, shape index: {}]   ;;  %s2756_s7 = inlined_call_operand.vmem [shape: f32[1,32], index: 7, kind: input, shape index: {}]   ;;  %s2757_s8 = inlined_call_operand.vmem [shape: f32[1,32], index: 8, kind: input, shape index: {}]   ;;  %s2758_s9 = inlined_call_operand.vmem [shape: bf16[32,32], index: 9, kind: input, shape index: {}]   ;;  %s2759_s10 = inlined_call_operand.vmem [shape: bf16[32,32], index: 10, kind: input, shape index: {}]   ;;  %s2760_s11 = inlined_call_operand.vmem [shape: bf16[32,32], index: 11, kind: input, shape index: {}]   ;;  %s2761_s12 = inlined_call_operand.vmem [shape: bf16[32,32], index: 12, kind: input, shape index: {}]   ;;  %s2762_s13 = inlined_call_operand.vmem [shape: f32[1,32], index: 13, kind: input, shape index: {}]   ;;  %s2763_s14 = inlined_call_operand.vmem [shape: f32[1,32], index: 14, kind: input, shape index: {}]   ;;  %s2764_s15 = inlined_call_operand.vmem [shape: f32[1,32], index: 15, kind: input, shape index: {}]   ;;  %s2765_s16 = inlined_call_operand.vmem [shape: bf16[32,64], index: 16, kind: input, shape index: {}]   ;;  %s2766_s17 = inlined_call_operand.vmem [shape: f32[1,64], index: 17, kind: input, shape index: {}]   ;;  %s2767_s18 = inlined_call_operand.vmem [shape: bf16[64,32], index: 18, kind: input, shape index: {}]   ;;  %s2768_s19 = inlined_call_operand.vmem [shape: f32[1,32], index: 19, kind: input, shape index: {}]   ;;  %s2769_s20 = inlined_call_operand.vmem [shape: f32[1,32], index: 20, kind: input, shape index: {}]   ;;  %s2770_s21 = inlined_call_operand.vmem [shape: f32[1,32], index: 21, kind: input, shape index: {}]   ;;  %s2771_s22 = inlined_call_operand.vmem [shape: f32[2,8,32], index: 22, kind: output, shape index: {}]  }
   0x1   :  { %2776 = sst [smem:[#allocation2_spill]] %s2749_s0 }
   0x2   :  { %2777 = sst [smem:[#allocation3_spill]] %s2750_s1 }
   0x3   :  { %2778 = sst [smem:[#allocation4_spill]] %s2751_s2 }
   0x4   :  { %2779 = sst [smem:[#allocation5_spill]] %s2752_s3  ;;  %s2498_s3 = smov 0  }
   0x5   :  { %2780 = sst [smem:[#allocation6_spill]] %s2753_s4 }
   0x6   :  { %2781 = sst [smem:[#allocation7_spill]] %s2754_s5 }
   0x7   :  { %2782 = sst [smem:[#allocation8_spill]] %s2755_s6 }
   0x8 LB: > { %s2065_s28 = sadd.s32 4294967295, %s2378_s3   ;;  %p2069_p0 = scmp.ge.s32.totalorder %s2378_s3, 1  ;;  %s2378_s3 = sphi %s2498_s3, %s32_s3  }
   0x9   : > { %p620_p1 = scmp.lt.s32.totalorder %s2378_s3, 3 }
   0xb   : > { %p621_p2 = pnand %p2069_p0, %p620_p1 }
   0xc   : > { %s2783_s4 = sld [smem:[#allocation5_spill]] (!%p621_p2)  ;;  %p684_p3 = scmp.lt.s32.totalorder (!%p621_p2), %s2065_s28, 1 }
   0xd   : > { %624 = sbr.rel (%p621_p2) target bundleno = 3572 (0xdf4), region = 108  ;;  %s2784_s1 = sld [smem:[#allocation4_spill]] (!%p621_p2) }
   0xe   : > { %s2785_s29 = sld [smem:[#allocation2_spill]] (!%p621_p2)  ;;  %s2382_s6 = smov (!%p621_p2), 112  }
   0xf   : > { %s2786_s23 = sld [smem:[#allocation6_spill]] (!%p621_p2) }
  0x10   : > { %s2787_s27 = sld [smem:[#allocation7_spill]] (!%p621_p2) }
  0x11   : > { %s2788_s5 = sld [smem:[#allocation8_spill]] (!%p621_p2) }
  0x12   : > { %v2328_v0 = vld [vmem:[%s2783_s4 + $0x8] sm:$0xff]   ;;  %v2380_v1 = vmov 0.0   ;;  %v2330_v3 = vld [vmem:[%s2783_s4] sm:$0xff]   ;;  %vm2381_vm0 = vmmov 0   ;;  %s2791_s28 = smov (!%p684_p3, %s2065_s28), 1  ;;  %vm729_vm1 = vcmask 261120   ;;  %v877_v27 = vlaneseq }
  0x13   : > { %2185 = vmatprep.subr.bf16.mxu1 %v2380_v1  ;;  %2177 = vmatprep.subr.bf16.mxu0 %v2380_v1  ;;  %v2329_v2 = vld [vmem:[%s2784_s1 + $0x8] sm:$0xff]   ;;  %v2331_v4 = vld [vmem:[%s2784_s1] sm:$0xff]   ;;  %s2526_s26 = sshll.u32 %s2791_s28, 3  ;;  %vm884_vm2 = vcmask 130048   ;;  %vm957_vm3 = vcmask 1043456   ;;  %vm932_vm5 = vcmask 64512  }
  0x14   : > { %2186 = vmatpush3.bf16.msra.mxu1 %v2328_v0  ;;  %2189 = vmatprep.mubr.msk.bf16.mxu1 %vm2381_vm0, %v2380_v1  ;;  %s687_s30 = scalar_lea.vmem %s2785_s29, %s2526_s26  ;;  %v878_v28 = vshrl.u32 %v877_v27, 7  ;;  %v880_v29 = vand.u32 127, %v877_v27  ;;  %s2789_s0 = sld [smem:[#allocation3_spill]]  ;;  %vm1925_vm6 = vcmask 523264  }
  0x15   : > { %2178 = vmatpush3.bf16.msra.mxu0 %v2329_v2  ;;  %2187 = vmatprep.subr.bf16.mxu1 %v2380_v1  ;;  %v2533_v5 = vld [vmem:[%s687_s30] sm:$0xff]  ;;  %v2332_v7 = vld [vmem:[%s2786_s23 + $0x8] sm:$0xff]   ;;  %s695_s24 = scalar_lea.vmem %s2771_s22, %s2526_s26 }
  0x16   : > { %2179 = vmatprep.subr.bf16.mxu0 %v2380_v1  ;;  %2181 = vmatprep.mubr.msk.bf16.mxu0 %vm2381_vm0, %v2380_v1  ;;  %v716_v6 = vpack.c.bf16 %v2533_v5, %v2533_v5  ;;  %v2333_v8 = vld [vmem:[%s2786_s23] sm:$0xff]   ;;  %vm881_vm4 = vcmp.le.s32.totalorder %v880_v29, %v878_v28  ;;  %v2335_v28 = vld [vmem:[%s2787_s27 + $0x8] sm:$0xff]  }
  0x17   : > { %v2334_v26 = vld [vmem:[%s2787_s27] sm:$0xff]  }
  0x18   : > { %2188 = vmatpush3.bf16.msra.mxu1 %v2330_v3 }
  0x19   : > { %2180 = vmatpush3.bf16.msra.mxu0 %v2331_v4  ;;  %2201 = vmatprep.subr.bf16.mxu1 %v2380_v1 }
  0x1a   : > { %2193 = vmatprep.subr.bf16.mxu0 %v2380_v1 }
  0x1b   : > { %2190 = vmatmul.mubr.msk.bf16.vlgmr.msra.gmra.mxu1 %vm729_vm1, %v716_v6 }
  0x1c   : > { %2182 = vmatmul.mubr.msk.bf16.vlgmr.msra.gmra.mxu0 %vm729_vm1, %v716_v6  ;;  %2203 = vmatprep.mubr.msk.bf16.mxu1 %vm2381_vm0, %v2380_v1 }
  0x1d   : > { %2197 = vmatprep.mubr.msk.bf16.mxu0 %vm2381_vm0, %v2380_v1  ;;  %2194 = vmatpush3.bf16.msra.mxu0 %v2332_v7 }
  0x1e   : > { %2195 = vmatprep.subr.bf16.mxu0 %v2380_v1 }
  0x21   : > { %2196 = vmatpush3.bf16.msra.mxu0 %v2333_v8 }
  0x22   : > { %2207 = vmatprep.subr.bf16.mxu0 %v2380_v1 }
  0x24   : > { %2198 = vmatmul.mubr.msk.bf16.vlgmr.msra.gmra.mxu0 %vm729_vm1, %v716_v6 }
  0x25   : > { %2209 = vmatprep.mubr.msk.bf16.mxu0 %vm2381_vm0, %v2380_v1 }
  0xdb   : > { %v819_v9 = vpop.f32.mrf.mxu1 }
  0xdc   : > { %v767_v10 = vpop.f32.mrf.mxu0  ;;  %v883_v11 = vpack.c.bf16 %v819_v9, %v819_v9 }
  0xdd   : > { %v2191_v12 = vpop.f32.mrf.mxu1  ;;  %v882_v15 = vpack.c.bf16 %v767_v10, %v767_v10 }
  0xde   : > { %v2183_v13 = vpop.f32.mrf.mxu0  ;;  %v889_v14 = vsel %vm884_vm2, %v883_v11, 0  ;;  %1062 = vrot.lane.b32.xlu0 %v883_v11, %s2382_s6 }
  0xdf   : > { %v822_v16 = vpop.f32.mrf.mxu1  ;;  %2202 = vmatpush3.bf16.xpose.msra.mxu1 %v889_v14 }
  0xe0   : > { %v770_v17 = vpop.f32.mrf.mxu0  ;;  %2213 = vmatprep.subr.bf16.mxu1 %v2380_v1 }
  0xe1   : > { %v2192_v18 = vpop.f32.mrf.mxu1 }
  0xe2   : > { %v2184_v19 = vpop.f32.mrf.mxu0  ;;  %1059 = vrot.lane.b32.xlu0 %v882_v15, %s2382_s6 }
  0xe4   : > { %v871_v20 = vpop.f32.mrf.mxu0 }
  0xe5   : > { %v953_v21 = vpack.c.bf16 %v871_v20, %v871_v20 }
  0xe6   : > { %2204 = vmatmul.mubr.msk.bf16.vlgmr.msra.gmra.mxu1 %vm884_vm2, %v882_v15  ;;  %v2199_v22 = vpop.f32.mrf.mxu0 }
  0xe7   : > { %2215 = vmatprep.mubr.msk.bf16.mxu1 %vm2381_vm0, %v2380_v1  ;;  %v959_v23 = vsel %vm957_vm3, %v953_v21, 0  ;;  %1132 = vrot.lane.b32.xlu1 %v953_v21, %s2382_s6 }
  0xe8   : > { %v874_v24 = vpop.f32.mrf.mxu0  ;;  %2208 = vmatpush3.bf16.msra.mxu0 %v959_v23  ;;  %2214 = vmatpush3.bf16.msra.mxu1 %v2334_v26 }
  0xe9   : > { %2219 = vmatprep.subr.bf16.mxu0 %v2380_v1  ;;  %2225 = vmatprep.subr.bf16.mxu1 %v2380_v1 }
  0xea   : > { %v2200_v25 = vpop.f32.mrf.mxu0 }
 0x150   : > { %v1063_v54 = vpop.permute.xlu0 %1062 }
 0x151   : > { %v1068_v56 = vsel %vm884_vm2, %v1063_v54, 0 }
 0x154   : > { %v1060_v57 = vpop.permute.xlu0 %1059 }
 0x159   : > { %v1133_v58 = vpop.permute.xlu1 %1132 }
 0x15a   : > { %v1138_v62 = vsel %vm957_vm3, %v1133_v58, 0 }
 0x1a6   : > { %v925_v30 = vpop.f32.mrf.mxu1 }
 0x1a7   : > { %v931_v31 = vsel %vm881_vm4, %v925_v30, -inf }
 0x1a8   : > { %v933_v32 = vsel %vm932_vm5, %v931_v31, -inf  ;;  %v2205_v33 = vpop.f32.mrf.mxu1 }
 0x1a9   : > { %v934_v34 = vrot.slane %v933_v32, 4 }
 0x1aa   : > { %v928_v35 = vpop.f32.mrf.mxu1 }
 0x1ab   : > { %v935_v36 = vmax.f32 %v933_v32, %v934_v34 }
 0x1ac   : > { %v2206_v37 = vpop.f32.mrf.mxu1 }
 0x1ad   : > { %v936_v38 = vrot.slane %v935_v36, 2 }
 0x1af   : > { %v937_v39 = vmax.f32 %v935_v36, %v936_v38  ;;  %v2086_v38 = vld [vmem:[%s2788_s5] ss:$0 sm:$0xff]  ;;  %s691_s5 = scalar_lea.vmem %s2789_s0, %s2526_s26 }
 0x1b1   : > { %v938_v40 = vrot.slane %v937_v39, 1 }
 0x1b3   : > { %v939_v41 = vmax.f32 %v937_v39, %v938_v40 }
 0x1b5   : > { %v940_v42 = vsub.f32 %v931_v31, %v939_v41 }
 0x1b7   : > { %v941_v43 = vmul.f32 1.442695, %v940_v42 }
 0x1b9   : > { %2350 = vpow2.f32 %v941_v43 }
 0x1c6   : > { %v2351_v44 = vpop.eup %2350 }
 0x1c7   : > { %v943_v45 = vsel %vm932_vm5, %v2351_v44, 0.0 }
 0x1c8   : > { %v944_v46 = vrot.slane %v943_v45, 4 }
 0x1ca   : > { %v945_v47 = vadd.f32 %v944_v46, %v943_v45 }
 0x1cc   : > { %v946_v48 = vrot.slane %v945_v47, 2 }
 0x1ce   : > { %v947_v49 = vadd.f32 %v946_v48, %v945_v47 }
 0x1d0   : > { %v948_v50 = vrot.slane %v947_v49, 1 }
 0x1d2   : > { %v949_v51 = vadd.f32 %v948_v50, %v947_v49 }
 0x1d4   : > { %2352 = vrcp.f32 %v949_v51 }
 0x1e1   : > { %v2353_v52 = vpop.eup %2352 }
 0x1e2   : > { %v951_v53 = vmul.f32 %v2353_v52, %v2351_v44  ;;  %v2336_v52 = vld [vmem:[%s2759_s10 + $0x8] sm:$0xff]  }
 0x1e4   : > { %v952_v55 = vpack.c.bf16 %v951_v53, %v951_v53  ;;  %v698_v53 = vld [vmem:[%s691_s5] sm:$0xff] }
 0x1e5   : > { %v1335_v54 = vpack.c.bf16 %v698_v53, %v698_v53 }
 0x1e6   : > { %2210 = vmatmul.mubr.msk.bf16.vlgmr.msra.gmra.mxu0 %vm932_vm5, %v952_v55  ;;  %v2338_v55 = vld [vmem:[%s2758_s9 + $0x8] sm:$0xff]  }
 0x1e7   : > { %2220 = vmatpush3.bf16.xpose.msra.mxu0 %v1068_v56  ;;  %2221 = vmatprep.mubr.msk.bf16.mxu0 %vm2381_vm0, %v2380_v1  ;;  %v2339_v56 = vld [vmem:[%s2758_s9] sm:$0xff]  }
 0x1e8   : > { %2231 = vmatprep.subr.bf16.mxu0 %v2380_v1 }
 0x1ee   : > { %2222 = vmatmul.mubr.msk.bf16.vlgmr.msra.gmra.mxu0 %vm884_vm2, %v1060_v57 }
 0x1ef   : > { %2233 = vmatprep.mubr.msk.bf16.mxu0 %vm2381_vm0, %v2380_v1  ;;  %2232 = vmatpush3.bf16.msra.mxu0 %v2335_v28 }
 0x1f0   : > { %2245 = vmatprep.subr.bf16.mxu0 %v2380_v1 }
 0x2a6   : > { %v995_v59 = vpop.f32.mrf.mxu0 }
 0x2a7   : > { %v1001_v60 = vpack.c.bf16 %v995_v59, %v995_v59 }
 0x2a8   : > { %v2211_v61 = vpop.f32.mrf.mxu0 }
 0x2a9   : > { %2216 = vmatmul.mubr.msk.bf16.vlgmr.msra.gmra.mxu1 %vm884_vm2, %v1001_v60  ;;  %v2091_v61 = vld [vmem:[%s2756_s7] ss:$0 sm:$0xff] }
 0x2aa   : > { %2226 = vmatpush3.bf16.msra.mxu1 %v1138_v62  ;;  %v998_v63 = vpop.f32.mrf.mxu0  ;;  %2227 = vmatprep.mubr.msk.bf16.mxu1 %vm2381_vm0, %v2380_v1 }
 0x2ab   : > { %2237 = vmatprep.subr.bf16.mxu1 %v2380_v1  ;;  %v2092_v63 = vld [vmem:[%s2757_s8] ss:$0 sm:$0xff] }
 0x2ac   : > { %v2212_v0 = vpop.f32.mrf.mxu0 }
 0x2ae   : > { %v1104_v2 = vpop.f32.mrf.mxu0 }
 0x2af   : > { %v1110_v3 = vsel %vm881_vm4, %v1104_v2, -inf }
 0x2b0   : > { %v1111_v4 = vsel %vm932_vm5, %v1110_v3, -inf  ;;  %v2223_v6 = vpop.f32.mrf.mxu0 }
 0x2b1   : > { %v1112_v7 = vrot.slane %v1111_v4, 4 }
 0x2b2   : > { %v1107_v8 = vpop.f32.mrf.mxu0 }
 0x2b3   : > { %v1113_v9 = vmax.f32 %v1111_v4, %v1112_v7 }
 0x2b4   : > { %v2224_v10 = vpop.f32.mrf.mxu0 }
 0x2b5   : > { %v1114_v11 = vrot.slane %v1113_v9, 2 }
 0x2b7   : > { %v1115_v12 = vmax.f32 %v1113_v9, %v1114_v11  ;;  %v2340_v11 = vld [vmem:[%s2760_s11 + $0x8] sm:$0xff]  }
 0x2b9   : > { %v1116_v13 = vrot.slane %v1115_v12, 1 }
 0x2bb   : > { %v1117_v14 = vmax.f32 %v1115_v12, %v1116_v13  ;;  %v2341_v12 = vld [vmem:[%s2760_s11] sm:$0xff]  }
 0x2bd   : > { %v1118_v15 = vsub.f32 %v1110_v3, %v1117_v14 }
 0x2bf   : > { %v1119_v16 = vmul.f32 1.442695, %v1118_v15 }
 0x2c1   : > { %2354 = vpow2.f32 %v1119_v16 }
 0x2ce   : > { %v2355_v17 = vpop.eup %2354 }
 0x2cf   : > { %v1121_v18 = vsel %vm932_vm5, %v2355_v17, 0.0 }
 0x2d0   : > { %v1122_v19 = vrot.slane %v1121_v18, 4 }
 0x2d2   : > { %v1123_v20 = vadd.f32 %v1122_v19, %v1121_v18 }
 0x2d4   : > { %v1124_v21 = vrot.slane %v1123_v20, 2 }
 0x2d6   : > { %v1125_v22 = vadd.f32 %v1124_v21, %v1123_v20 }
 0x2d8   : > { %v1126_v23 = vrot.slane %v1125_v22, 1 }
 0x2da   : > { %v1127_v24 = vadd.f32 %v1126_v23, %v1125_v22 }
 0x2dc   : > { %2356 = vrcp.f32 %v1127_v24  ;;  %v2342_v24 = vld [vmem:[%s2761_s12] sm:$0xff]  }
 0x2e9   : > { %v2357_v25 = vpop.eup %2356 }
 0x2ea   : > { %v1129_v26 = vmul.f32 %v2357_v25, %v2355_v17 }
 0x2ec   : > { %v1130_v27 = vpack.c.bf16 %v1129_v26, %v1129_v26 }
 0x2ee   : > { %2228 = vmatmul.mubr.msk.bf16.vlgmr.msra.gmra.mxu1 %vm932_vm5, %v1130_v27 }
 0x2ef   : > { %2241 = vmatprep.mubr.msk.bf16.mxu1 %vm2381_vm0, %v2380_v1  ;;  %2238 = vmatpush3.bf16.msra.mxu1 %v2338_v55 }
 0x2f0   : > { %2239 = vmatprep.subr.bf16.mxu1 %v2380_v1 }
 0x2f3   : > { %2240 = vmatpush3.bf16.msra.mxu1 %v2339_v56 }
 0x2f4   : > { %2253 = vmatprep.subr.bf16.mxu1 %v2380_v1 }
 0x369   : > { %v1045_v29 = vpop.f32.mrf.mxu1 }
 0x36a   : > { %v1057_v39 = vadd.f32 %v2086_v38, %v1045_v29 }
 0x36b   : > { %v2217_v30 = vpop.f32.mrf.mxu1 }
 0x36d   : > { %v1048_v31 = vpop.f32.mrf.mxu1 }
 0x36f   : > { %v2218_v32 = vpop.f32.mrf.mxu1 }
 0x3ae   : > { %v1174_v33 = vpop.f32.mrf.mxu1 }
 0x3af   : > { %v1180_v34 = vpack.c.bf16 %v1174_v33, %v1174_v33 }
 0x3b0   : > { %v2229_v35 = vpop.f32.mrf.mxu1 }
 0x3b1   : > { %2234 = vmatmul.mubr.msk.bf16.vlgmr.msra.gmra.mxu0 %vm884_vm2, %v1180_v34 }
 0x3b2   : > { %v1177_v36 = vpop.f32.mrf.mxu1  ;;  %2249 = vmatprep.mubr.msk.bf16.mxu0 %vm2381_vm0, %v2380_v1  ;;  %2246 = vmatpush3.bf16.msra.mxu0 %v2336_v52 }
 0x3b3   : > { %2247 = vmatprep.subr.bf16.mxu0 %v2380_v1 }
 0x3b4   : > { %v2230_v37 = vpop.f32.mrf.mxu1 }
 0x471   : > { %v1224_v40 = vpop.f32.mrf.mxu0 }
 0x472   : > { %v1230_v41 = vadd.f32 %v1224_v40, %v1057_v39 }
 0x473   : > { %v2235_v42 = vpop.f32.mrf.mxu0 }
 0x474   : > { %v1233_v43 = vadd.f32 %v1230_v41, %v2533_v5  ;;  %v2337_v5 = vld [vmem:[%s2759_s10] sm:$0xff]  }
 0x475   : > { %v1227_v44 = vpop.f32.mrf.mxu0  ;;  %2248 = vmatpush3.bf16.msra.mxu0 %v2337_v5 }
 0x476   : > { %v1234_v45 = vsel %vm729_vm1, %v1233_v43, 0.0  ;;  %2261 = vmatprep.subr.bf16.mxu0 %v2380_v1 }
 0x477   : > { %1235 = vadd.xlane.f32.xlu1 %v1234_v45  ;;  %v2236_v46 = vpop.f32.mrf.mxu0 }
 0x478   : > { %2250 = vmatmul.mubr.msk.bf16.vlgmr.msra.gmra.mxu0 %vm729_vm1, %v1335_v54 }
 0x479   : > { %2263 = vmatprep.mubr.msk.bf16.mxu0 %vm2381_vm0, %v2380_v1 }
 0x500   : > { %v1236_v47 = vpop.xlane.xlu1 %1235 }
 0x501   : > { %v1238_v48 = vmul.f32 0.03125, %v1236_v47 }
 0x503   : > { %v1239_v49 = vsub.f32 %v1233_v43, %v1238_v48 }
 0x505   : > { %v1240_v50 = vmul.f32 %v1239_v49, %v1239_v49 }
 0x507   : > { %v1241_v51 = vsel %vm729_vm1, %v1240_v50, 0.0 }
 0x508   : > { %1242 = vadd.xlane.f32.xlu0 %v1241_v51 }
 0x538   : > { %v1385_v4 = vpop.f32.mrf.mxu0 }
 0x539   : > { %v1444_v6 = vpack.c.bf16 %v1385_v4, %v1385_v4 }
 0x53a   : > { %v2251_v7 = vpop.f32.mrf.mxu0 }
 0x53b   : > { %v1449_v8 = vsel %vm884_vm2, %v1444_v6, 0  ;;  %1619 = vrot.lane.b32.xlu0 %v1444_v6, %s2382_s6 }
 0x53c   : > { %v1388_v9 = vpop.f32.mrf.mxu0  ;;  %2262 = vmatpush3.bf16.xpose.msra.mxu0 %v1449_v8 }
 0x53d   : > { %2273 = vmatprep.subr.bf16.mxu0 %v2380_v1 }
 0x53e   : > { %v2252_v10 = vpop.f32.mrf.mxu0 }
 0x591   : > { %v1243_v57 = vpop.xlane.xlu0 %1242 }
 0x592   : > { %v1244_v58 = vmul.f32 0.03125, %v1243_v57 }
 0x594   : > { %v1245_v59 = vadd.f32 1e-05, %v1244_v58 }
 0x596   : > { %2358 = vrsqrt.f32 %v1245_v59 }
 0x5a3   : > { %v2359_v60 = vpop.eup %2358 }
 0x5a4   : > { %v1247_v62 = vmul.f32 %v2359_v60, %v1239_v49 }
 0x5a6   : > { %v1254_v0 = vmul.f32 %v2091_v61, %v1247_v62 }
 0x5a8   : > { %v2633_v2 = vadd.f32 %v2092_v63, %v1254_v0 }
 0x5aa   : > { %v1279_v3 = vpack.c.bf16 %v2633_v2, %v2633_v2 }
 0x5ac   : > { %2242 = vmatmul.mubr.msk.bf16.vlgmr.msra.gmra.mxu1 %vm729_vm1, %v1279_v3 }
 0x5ad   : > { %2257 = vmatprep.mubr.msk.bf16.mxu1 %vm2381_vm0, %v2380_v1  ;;  %2254 = vmatpush3.bf16.msra.mxu1 %v2340_v11  ;;  %v1620_v48 = vpop.permute.xlu0 %1619 }
 0x5ae   : > { %2255 = vmatprep.subr.bf16.mxu1 %v2380_v1  ;;  %v1625_v50 = vsel %vm884_vm2, %v1620_v48, 0 }
 0x5b1   : > { %2256 = vmatpush3.bf16.msra.mxu1 %v2341_v12 }
 0x5b2   : > { %2267 = vmatprep.subr.bf16.mxu1 %v2380_v1 }
 0x5b4   : > { %2258 = vmatmul.mubr.msk.bf16.vlgmr.msra.gmra.mxu1 %vm729_vm1, %v1335_v54 }
 0x5b5   : > { %2269 = vmatprep.mubr.msk.bf16.mxu1 %vm2381_vm0, %v2380_v1 }
 0x66c   : > { %v1329_v13 = vpop.f32.mrf.mxu1 }
 0x66d   : > { %v1443_v14 = vpack.c.bf16 %v1329_v13, %v1329_v13 }
 0x66e   : > { %v2243_v15 = vpop.f32.mrf.mxu1 }
 0x66f   : > { %1616 = vrot.lane.b32.xlu1 %v1443_v14, %s2382_s6  ;;  %2264 = vmatmul.mubr.msk.bf16.vlgmr.msra.gmra.mxu0 %vm884_vm2, %v1443_v14 }
 0x670   : > { %v1332_v16 = vpop.f32.mrf.mxu1  ;;  %2275 = vmatprep.mubr.msk.bf16.mxu0 %vm2381_vm0, %v2380_v1  ;;  %2274 = vmatpush3.bf16.msra.mxu0 %v2342_v24 }
 0x671   : > { %2285 = vmatprep.subr.bf16.mxu0 %v2380_v1 }
 0x672   : > { %v2244_v17 = vpop.f32.mrf.mxu1 }
 0x674   : > { %v1437_v18 = vpop.f32.mrf.mxu1 }
 0x675   : > { %v1511_v19 = vpack.c.bf16 %v1437_v18, %v1437_v18 }
 0x676   : > { %v2259_v20 = vpop.f32.mrf.mxu1 }
 0x677   : > { %v1516_v21 = vsel %vm957_vm3, %v1511_v19, 0  ;;  %1688 = vrot.lane.b32.xlu1 %v1511_v19, %s2382_s6 }
 0x678   : > { %v1440_v22 = vpop.f32.mrf.mxu1  ;;  %2268 = vmatpush3.bf16.msra.mxu1 %v1516_v21  ;;  %v2343_v21 = vld [vmem:[%s2761_s12 + $0x8] sm:$0xff]  }
 0x679   : > { %2279 = vmatprep.subr.bf16.mxu1 %v2380_v1 }
 0x67a   : > { %v2260_v23 = vpop.f32.mrf.mxu1 }
 0x6e1   : > { %v1617_v51 = vpop.permute.xlu1 %1616 }
 0x6e9   : > { %v1689_v52 = vpop.permute.xlu1 %1688 }
 0x6ea   : > { %v1694_v55 = vsel %vm957_vm3, %v1689_v52, 0  ;;  %v2111_v52 = vld [vmem:[%s2763_s14] ss:$0 sm:$0xff] }
 0x72f   : > { %v1485_v25 = vpop.f32.mrf.mxu0 }
 0x730   : > { %v1491_v26 = vsel %vm932_vm5, %v1485_v25, -inf }
 0x731   : > { %v1492_v27 = vrot.slane %v1491_v26, 4  ;;  %v2265_v28 = vpop.f32.mrf.mxu0 }
 0x733   : > { %v1493_v29 = vmax.f32 %v1491_v26, %v1492_v27  ;;  %v1488_v30 = vpop.f32.mrf.mxu0 }
 0x735   : > { %v1494_v31 = vrot.slane %v1493_v29, 2  ;;  %v2266_v32 = vpop.f32.mrf.mxu0 }
 0x737   : > { %v1495_v33 = vmax.f32 %v1493_v29, %v1494_v31  ;;  %v2106_v31 = vld [vmem:[%s2762_s13] ss:$0 sm:$0xff] }
 0x739   : > { %v1496_v34 = vrot.slane %v1495_v33, 1 }
 0x73b   : > { %v1497_v35 = vmax.f32 %v1495_v33, %v1496_v34 }
 0x73d   : > { %v1498_v36 = vsub.f32 %v1485_v25, %v1497_v35 }
 0x73f   : > { %v1499_v37 = vmul.f32 1.442695, %v1498_v36 }
 0x741   : > { %2360 = vpow2.f32 %v1499_v37 }
 0x74e   : > { %v2361_v38 = vpop.eup %2360 }
 0x74f   : > { %v1501_v39 = vsel %vm932_vm5, %v2361_v38, 0.0 }
 0x750   : > { %v1502_v40 = vrot.slane %v1501_v39, 4 }
 0x752   : > { %v1503_v41 = vadd.f32 %v1502_v40, %v1501_v39 }
 0x754   : > { %v1504_v42 = vrot.slane %v1503_v41, 2 }
 0x756   : > { %v1505_v43 = vadd.f32 %v1504_v42, %v1503_v41 }
 0x758   : > { %v1506_v44 = vrot.slane %v1505_v43, 1 }
 0x75a   : > { %v1507_v45 = vadd.f32 %v1506_v44, %v1505_v43 }
 0x75c   : > { %2362 = vrcp.f32 %v1507_v45  ;;  %v2344_v45 = vld [vmem:[%s2765_s16 + $0x8] sm:$0xff]  }
 0x769   : > { %v2363_v46 = vpop.eup %2362 }
 0x76a   : > { %v1509_v47 = vmul.f32 %v2363_v46, %v2361_v38  ;;  %v2346_v46 = vld [vmem:[%s2767_s18 + $0x18] sm:$0xff]  }
 0x76c   : > { %v1510_v49 = vpack.c.bf16 %v1509_v47, %v1509_v47  ;;  %v2347_v47 = vld [vmem:[%s2767_s18 + $0x10] sm:$0xff]  }
 0x76e   : > { %2270 = vmatmul.mubr.msk.bf16.vlgmr.msra.gmra.mxu1 %vm932_vm5, %v1510_v49 }
 0x76f   : > { %2280 = vmatpush3.bf16.xpose.msra.mxu1 %v1625_v50  ;;  %2281 = vmatprep.mubr.msk.bf16.mxu1 %vm2381_vm0, %v2380_v1 }
 0x770   : > { %2291 = vmatprep.subr.bf16.mxu1 %v2380_v1 }
 0x776   : > { %2282 = vmatmul.mubr.msk.bf16.vlgmr.msra.gmra.mxu1 %vm884_vm2, %v1617_v51 }
 0x777   : > { %2293 = vmatprep.mubr.msk.bf16.mxu1 %vm2381_vm0, %v2380_v1  ;;  %2292 = vmatpush3.bf16.msra.mxu1 %v2343_v21 }
 0x778   : > { %2305 = vmatprep.subr.bf16.mxu1 %v2380_v1 }
 0x82e   : > { %v1552_v5 = vpop.f32.mrf.mxu1 }
 0x82f   : > { %v1558_v53 = vpack.c.bf16 %v1552_v5, %v1552_v5 }
 0x830   : > { %v2271_v54 = vpop.f32.mrf.mxu1 }
 0x831   : > { %2276 = vmatmul.mubr.msk.bf16.vlgmr.msra.gmra.mxu0 %vm884_vm2, %v1558_v53  ;;  %v2112_v53 = vld [vmem:[%s2764_s15] ss:$0 sm:$0xff] }
 0x832   : > { %2286 = vmatpush3.bf16.msra.mxu0 %v1694_v55  ;;  %v1555_v56 = vpop.f32.mrf.mxu1  ;;  %2287 = vmatprep.mubr.msk.bf16.mxu0 %vm2381_vm0, %v2380_v1 }
 0x833   : > { %2297 = vmatprep.subr.bf16.mxu0 %v2380_v1 }
 0x834   : > { %v2272_v57 = vpop.f32.mrf.mxu1 }
 0x835   : > { %v2348_v57 = vld [vmem:[%s2767_s18 + $0x8] sm:$0xff]  }
 0x836   : > { %v1661_v58 = vpop.f32.mrf.mxu1 }
 0x837   : > { %v1667_v59 = vsel %vm932_vm5, %v1661_v58, -inf }
 0x838   : > { %v1668_v60 = vrot.slane %v1667_v59, 4  ;;  %v2283_v61 = vpop.f32.mrf.mxu1 }
 0x83a   : > { %v1669_v62 = vmax.f32 %v1667_v59, %v1668_v60  ;;  %v1664_v63 = vpop.f32.mrf.mxu1  ;;  %v2113_v59 = vld [vmem:[%s2766_s17] ss:$0 sm:$0xff] }
 0x83c   : > { %v1670_v0 = vrot.slane %v1669_v62, 2  ;;  %v2284_v3 = vpop.f32.mrf.mxu1 }
 0x83e   : > { %v1671_v4 = vmax.f32 %v1669_v62, %v1670_v0 }
 0x840   : > { %v1672_v6 = vrot.slane %v1671_v4, 1 }
 0x842   : > { %v1673_v7 = vmax.f32 %v1671_v4, %v1672_v6 }
 0x844   : > { %v1674_v8 = vsub.f32 %v1661_v58, %v1673_v7  ;;  %v2349_v58 = vld [vmem:[%s2767_s18] sm:$0xff]  }
 0x846   : > { %v1675_v9 = vmul.f32 1.442695, %v1674_v8 }
 0x848   : > { %2364 = vpow2.f32 %v1675_v9 }
 0x855   : > { %v2365_v10 = vpop.eup %2364 }
 0x856   : > { %v1677_v11 = vsel %vm932_vm5, %v2365_v10, 0.0 }
 0x857   : > { %v1678_v12 = vrot.slane %v1677_v11, 4 }
 0x859   : > { %v1679_v13 = vadd.f32 %v1678_v12, %v1677_v11 }
 0x85b   : > { %v1680_v14 = vrot.slane %v1679_v13, 2 }
 0x85d   : > { %v1681_v15 = vadd.f32 %v1680_v14, %v1679_v13 }
 0x85f   : > { %v1682_v16 = vrot.slane %v1681_v15, 1 }
 0x861   : > { %v1683_v17 = vadd.f32 %v1682_v16, %v1681_v15 }
 0x863   : > { %2366 = vrcp.f32 %v1683_v17 }
 0x870   : > { %v2367_v18 = vpop.eup %2366 }
 0x871   : > { %v1685_v19 = vmul.f32 %v2367_v18, %v2365_v10 }
 0x873   : > { %v1686_v20 = vpack.c.bf16 %v1685_v19, %v1685_v19 }
 0x875   : > { %2288 = vmatmul.mubr.msk.bf16.vlgmr.msra.gmra.mxu0 %vm932_vm5, %v1686_v20 }
 0x876   : > { %2301 = vmatprep.mubr.msk.bf16.mxu0 %vm2381_vm0, %v2380_v1  ;;  %2298 = vmatpush3.bf16.msra.mxu0 %v2344_v45 }
 0x877   : > { %2299 = vmatprep.subr.bf16.mxu0 %v2380_v1 }
 0x8f1   : > { %v1602_v22 = vpop.f32.mrf.mxu0 }
 0x8f2   : > { %v1614_v32 = vadd.f32 %v2106_v31, %v1602_v22  ;;  %v2123_v22 = vld [vmem:[%s2769_s20] ss:$0 sm:$0xff] }
 0x8f3   : > { %v2277_v23 = vpop.f32.mrf.mxu0 }
 0x8f5   : > { %v1605_v24 = vpop.f32.mrf.mxu0 }
 0x8f6   : > { %v2124_v24 = vld [vmem:[%s2770_s21] ss:$0 sm:$0xff] }
 0x8f7   : > { %v2278_v25 = vpop.f32.mrf.mxu0 }
 0x935   : > { %v1730_v26 = vpop.f32.mrf.mxu0 }
 0x936   : > { %v1736_v27 = vpack.c.bf16 %v1730_v26, %v1730_v26 }
 0x937   : > { %v2289_v28 = vpop.f32.mrf.mxu0 }
 0x938   : > { %2294 = vmatmul.mubr.msk.bf16.vlgmr.msra.gmra.mxu1 %vm884_vm2, %v1736_v27 }
 0x939   : > { %v1733_v29 = vpop.f32.mrf.mxu0  ;;  %2313 = vmatprep.mubr.msk.bf16.mxu1 %vm2381_vm0, %v2380_v1  ;;  %2306 = vmatpush3.bf16.msra.mxu1 %v2346_v46 }
 0x93a   : > { %2307 = vmatprep.subr.bf16.mxu1 %v2380_v1 }
 0x93b   : > { %v2290_v30 = vpop.f32.mrf.mxu0 }
 0x93d   : > { %2308 = vmatpush3.bf16.msra.mxu1 %v2347_v47 }
 0x93e   : > { %2309 = vmatprep.subr.bf16.mxu1 %v2380_v1 }
 0x941   : > { %2310 = vmatpush3.bf16.msra.mxu1 %v2348_v57 }
 0x942   : > { %2311 = vmatprep.subr.bf16.mxu1 %v2380_v1  ;;  %v2117_v1 = vld [vmem:[%s2768_s19] ss:$0 sm:$0xff] }
 0x945   : > { %2312 = vmatpush3.bf16.msra.mxu1 %v2349_v58 }
 0x9f8   : > { %v1780_v33 = vpop.f32.mrf.mxu1 }
 0x9f9   : > { %v1786_v34 = vadd.f32 %v1780_v33, %v1614_v32 }
 0x9fa   : > { %v2295_v35 = vpop.f32.mrf.mxu1 }
 0x9fb   : > { %v1789_v36 = vadd.f32 %v1786_v34, %v2633_v2  ;;  %v2345_v2 = vld [vmem:[%s2765_s16] sm:$0xff]  }
 0x9fc   : > { %v1783_v37 = vpop.f32.mrf.mxu1  ;;  %2300 = vmatpush3.bf16.msra.mxu0 %v2345_v2 }
 0x9fd   : > { %v1790_v38 = vsel %vm729_vm1, %v1789_v36, 0.0 }
 0x9fe   : > { %1791 = vadd.xlane.f32.xlu0 %v1790_v38  ;;  %v2296_v39 = vpop.f32.mrf.mxu1 }
 0xa87   : > { %v1792_v40 = vpop.xlane.xlu0 %1791 }
 0xa88   : > { %v1793_v41 = vmul.f32 0.03125, %v1792_v40 }
 0xa8a   : > { %v1794_v42 = vsub.f32 %v1789_v36, %v1793_v41 }
 0xa8c   : > { %v1795_v43 = vmul.f32 %v1794_v42, %v1794_v42 }
 0xa8e   : > { %v1796_v44 = vsel %vm729_vm1, %v1795_v43, 0.0 }
 0xa8f   : > { %1797 = vadd.xlane.f32.xlu1 %v1796_v44 }
 0xb18   : > { %v1798_v48 = vpop.xlane.xlu1 %1797 }
 0xb19   : > { %v1799_v49 = vmul.f32 0.03125, %v1798_v48 }
 0xb1b   : > { %v1800_v50 = vadd.f32 1e-05, %v1799_v49 }
 0xb1d   : > { %2368 = vrsqrt.f32 %v1800_v50 }
 0xb2a   : > { %v2369_v51 = vpop.eup %2368 }
 0xb2b   : > { %v1802_v5 = vmul.f32 %v2369_v51, %v1794_v42 }
 0xb2d   : > { %v1809_v54 = vmul.f32 %v2111_v52, %v1802_v5 }
 0xb2f   : > { %v1816_v55 = vadd.f32 %v2112_v53, %v1809_v54 }
 0xb31   : > { %v1831_v56 = vpack.c.bf16 %v1816_v55, %v1816_v55 }
 0xb33   : > { %2302 = vmatmul.mubr.msk.bf16.vlgmr.msra.gmra.mxu0 %vm729_vm1, %v1831_v56 }
 0xbf3   : > { %v1887_v60 = vpop.f32.mrf.mxu0 }
 0xbf4   : > { %v1888_v61 = vadd.f32 %v2113_v59, %v1887_v60 }
 0xbf5   : > { %v2303_v62 = vpop.f32.mrf.mxu0 }
 0xbf6   : > { %v1893_v63 = vmax.f32 %v1888_v61, 0.0 }
 0xbf7   : > { %v1890_v0 = vpop.f32.mrf.mxu0 }
 0xbf8   : > { %v1894_v3 = vpack.c.bf16 %v1893_v63, %v1893_v63 }
 0xbf9   : > { %v2304_v4 = vpop.f32.mrf.mxu0 }
 0xbfa   : > { %2314 = vmatmul.mubr.msk.bf16.vlgmr.msra.gmra.mxu1 %vm1925_vm6, %v1894_v3 }
 0xcba   : > { %v1963_v6 = vpop.f32.mrf.mxu1 }
 0xcbb   : > { %v1964_v7 = vadd.f32 %v2117_v1, %v1963_v6 }
 0xcbc   : > { %v2315_v8 = vpop.f32.mrf.mxu1 }
 0xcbd   : > { %v1971_v9 = vadd.f32 %v1964_v7, %v1816_v55 }
 0xcbe   : > { %v1966_v10 = vpop.f32.mrf.mxu1 }
 0xcbf   : > { %v1972_v11 = vsel %vm729_vm1, %v1971_v9, 0.0 }
 0xcc0   : > { %1973 = vadd.xlane.f32.xlu0 %v1972_v11  ;;  %v2316_v12 = vpop.f32.mrf.mxu1 }
 0xd49   : > { %v1974_v13 = vpop.xlane.xlu0 %1973 }
 0xd4a   : > { %v1975_v14 = vmul.f32 0.03125, %v1974_v13 }
 0xd4c   : > { %v1976_v15 = vsub.f32 %v1971_v9, %v1975_v14 }
 0xd4e   : > { %v1977_v16 = vmul.f32 %v1976_v15, %v1976_v15 }
 0xd50   : > { %v1978_v17 = vsel %vm729_vm1, %v1977_v16, 0.0 }
 0xd51   : > { %1979 = vadd.xlane.f32.xlu0 %v1978_v17 }
 0xdda   : > { %v1980_v18 = vpop.xlane.xlu0 %1979 }
 0xddb   : > { %v1981_v19 = vmul.f32 0.03125, %v1980_v18 }
 0xddd   : > { %v1982_v20 = vadd.f32 1e-05, %v1981_v19 }
 0xddf   : > { %2370 = vrsqrt.f32 %v1982_v20 }
 0xdec   : > { %v2371_v21 = vpop.eup %2370 }
 0xded   : > { %v1984_v23 = vmul.f32 %v2371_v21, %v1976_v15 }
 0xdef   : > { %v1991_v25 = vmul.f32 %v2123_v22, %v1984_v23 }
 0xdf1   : > { %v1998_v26 = vadd.f32 %v2124_v24, %v1991_v25 }
 0xdf3   : > { %1999 = vst.msk [vmem:[%s695_s24] sm:$0xff] %vm729_vm1, %v1998_v26 }
 0xdf4 PF: > { %s32_s3 = sadd.s32 1, %s2378_s3  }
 0xdf5   : > { %p29_p4 = scmp.ge.s32.totalorder %s32_s3, 4  }
 0xdf7   :  { %31 = sbr.rel (!%p29_p4) target bundleno = 8 (0x8), region = 141 }

</bundles_post_ra>
